<compile_context>
chip_gen: v7x
topology: tpu7x:2x2x1
jax: 0.10.0
libtpu: 0.0.40
codegen_flags: <defaults>
</compile_context>

<pallas_src>
import functools

import jax
import jax.numpy as jnp
from jax import lax
from jax.experimental import pallas as pl
from jax.experimental.pallas import tpu as pltpu


def _layernorm(x, gamma, beta, eps=1e-5):
    # PyTorch LayerNorm: biased variance over the last dim, eps inside the sqrt.
    mean = jnp.mean(x, axis=-1, keepdims=True)
    cent = x - mean
    var = jnp.mean(cent * cent, axis=-1, keepdims=True)
    return cent * lax.rsqrt(var + eps) * gamma + beta


def _dot_nt(a, b):
    # (m, d) x (n, d) -> (m, n); contract the last dims -> no explicit transpose.
    return lax.dot_general(a, b, dimension_numbers=(((1,), (1,)), ((), ())),
                           preferred_element_type=jnp.float32)


def transformer_block_kernel(
    x_ref,
    wq_ref, bq_ref, wk_ref, bk_ref, wv_ref, bv_ref,
    wo_ref, bo_ref,
    g1_ref, be1_ref,
    w1_ref, b1_ref, w2_ref, b2_ref,
    g2_ref, be2_ref,
    o_ref,
    h1_scr, h1b_scr, acc_scr,
    *, num_heads,
):
    hb = pl.program_id(1)

    # ---- phase 1 (once per batch): self-attention + residual + LayerNorm1 ----
    @pl.when(hb == 0)
    def _attention():
        x = x_ref[0]                          # (S, D) f32
        S, D = x.shape
        d_k = D // num_heads

        xb = x.astype(jnp.bfloat16)
        # 1/sqrt(d_k) is pre-folded into Wq and bq in the wrapper; q/k/v are cast to
        # bf16 once here (no per-head-slice casts).
        q = (jnp.dot(xb, wq_ref[...], preferred_element_type=jnp.float32)
             + bq_ref[...]).astype(jnp.bfloat16)
        k = (jnp.dot(xb, wk_ref[...], preferred_element_type=jnp.float32)
             + bk_ref[...]).astype(jnp.bfloat16)
        v = (jnp.dot(xb, wv_ref[...], preferred_element_type=jnp.float32)
             + bv_ref[...]).astype(jnp.bfloat16)

        # TODO(synk): group heads to match the MXU systolic depth (2 heads on v5e
        # K=128, 4 heads on v6e/v7x K=256) for the score / P@V contractions once the
        # minor-dim-splitting reshape relayout is verified on the target Mosaic
        # version; the Wo projection below already contracts over the full K=D.
        # TODO(synk): for long S, add a query-block grid axis + online-softmax
        # (flash) KV loop instead of the full (S, S) score tile per head; this also
        # supplies a second "parallel" axis for v7x megacore when N is small/odd.
        ctx_parts = []
        for h in range(num_heads):
            sl = slice(h * d_k, (h + 1) * d_k)
            q_h = q[:, sl]                               # (S, d_k) bf16
            k_h = k[:, sl]
            v_h = v[:, sl]

            scores = _dot_nt(q_h, k_h)                   # (S, S) f32, no transpose
            scores = scores - jnp.max(scores, axis=-1, keepdims=True)
            p = jnp.exp(scores)                          # EUP
            denom = jnp.sum(p, axis=-1, keepdims=True)
            p = p * pl.reciprocal(denom, approx=False)   # exact EUP recip, no VPU div

            ctx_parts.append(jnp.dot(p.astype(jnp.bfloat16), v_h,
                                     preferred_element_type=jnp.float32))  # (S, d_k)

        # single wide output projection: one (S,D)x(D,D) matmul, full MXU fill.
        ctx = jnp.concatenate(ctx_parts, axis=-1).astype(jnp.bfloat16)     # (S, D)
        attn = jnp.dot(ctx, wo_ref[...],
                       preferred_element_type=jnp.float32) + bo_ref[...]

        h1 = _layernorm(attn + x, g1_ref[...], be1_ref[...])
        h1_scr[...] = h1                                  # f32 copy for LN2 residual
        h1b_scr[...] = h1.astype(jnp.bfloat16)            # bf16 copy for FFN matmuls
        acc_scr[...] = jnp.zeros_like(acc_scr)

    # ---- phase 2 (every hidden chunk): FFN partial product --------------------
    ff = jnp.dot(h1b_scr[...], w1_ref[...],
                 preferred_element_type=jnp.float32) + b1_ref[...]
    ff = jnp.maximum(ff, 0.0)
    acc_scr[...] += jnp.dot(ff.astype(jnp.bfloat16), w2_ref[...],
                            preferred_element_type=jnp.float32)

    # ---- phase 3 (last hidden chunk): residual + LayerNorm2 + store -----------
    @pl.when(hb == pl.num_programs(1) - 1)
    def _finalize():
        y = _layernorm(acc_scr[...] + b2_ref[...] + h1_scr[...],
                       g2_ref[...], be2_ref[...])
        # TODO(synk): training-mode dropout (random mask + 1/(1-p) scaling) not
        # applied; inference-mode dropout is the identity reproduced here.
        o_ref[0] = y.astype(o_ref.dtype)


def _pick_vmem_limit():
    # Generation-aware VMEM budget: ~75% of physical per-TC VMEM, capped at 112 MiB.
    # (v7x: 64 MiB -> 48 MiB; v5e/v6e: 128 MiB -> 96 MiB.)  Leaves headroom for
    # compiler-internal scratch and spills.
    try:
        cap = pltpu.get_tpu_info().vmem_capacity_bytes
        return min(int(cap * 3 // 4), 112 * 1024 * 1024)
    except Exception:
        return 48 * 1024 * 1024


def transformer_block(x, params, num_heads, h_blk=None):
    (wq, bq, wk, bk, wv, bv, wo, bo,
     g1, be1, w1, b1, w2, b2, g2, be2) = params
    N, S, D = x.shape
    H = w1.shape[1]
    assert D % num_heads == 0
    d_k = D // num_heads

    # FFN hidden-dim tile: lane-dense (multiple of 128) or the full extent; prefer
    # the largest chunk whose W1+W2 bf16 slices fit a modest per-chunk budget.
    if h_blk is None:
        budget = 8 * 1024 * 1024                    # bytes for one (W1,W2) bf16 chunk pair
        h_blk = 128
        for cand in (H, 2048, 1024, 512, 256):
            if H % cand == 0 and 4 * D * cand <= budget:
                h_blk = cand
                break
    assert H % h_blk == 0 and (h_blk % 128 == 0 or h_blk == H)
    n_hb = H // h_blk

    # bf16 MXU weights; biases / LayerNorm params stay f32.  Fold 1/sqrt(d_k) into
    # Wq (before the bf16 cast) and identically into bq.
    bf = jnp.bfloat16
    scale = 1.0 / float(d_k) ** 0.5
    wq = (wq.astype(jnp.float32) * scale).astype(bf)
    bq = bq.astype(jnp.float32) * scale
    wk, wv, wo, w1, w2 = (w.astype(bf) for w in (wk, wv, wo, w1, w2))

    kernel = functools.partial(transformer_block_kernel, num_heads=num_heads)

    # Grid-invariant operands (constant index_map) are single-buffered: default
    # double-buffering would just burn VMEM on weights that never change.
    const = dict(pipeline_mode=pl.Buffered(1))
    in_specs = [
        pl.BlockSpec((1, S, D), lambda n, hb: (n, 0, 0)),            # x
        pl.BlockSpec((D, D), lambda n, hb: (0, 0), **const),         # Wq (scale folded)
        pl.BlockSpec((1, D), lambda n, hb: (0, 0), **const),         # bq (scale folded)
        pl.BlockSpec((D, D), lambda n, hb: (0, 0), **const),         # Wk
        pl.BlockSpec((1, D), lambda n, hb: (0, 0), **const),         # bk
        pl.BlockSpec((D, D), lambda n, hb: (0, 0), **const),         # Wv
        pl.BlockSpec((1, D), lambda n, hb: (0, 0), **const),         # bv
        pl.BlockSpec((D, D), lambda n, hb: (0, 0), **const),         # Wo
        pl.BlockSpec((1, D), lambda n, hb: (0, 0), **const),         # bo
        pl.BlockSpec((1, D), lambda n, hb: (0, 0), **const),         # ln1 gamma
        pl.BlockSpec((1, D), lambda n, hb: (0, 0), **const),         # ln1 beta
        pl.BlockSpec((D, h_blk), lambda n, hb: (0, hb)),             # W1 chunk
        pl.BlockSpec((1, h_blk), lambda n, hb: (0, hb)),             # b1 chunk
        pl.BlockSpec((h_blk, D), lambda n, hb: (hb, 0)),             # W2 chunk
        pl.BlockSpec((1, D), lambda n, hb: (0, 0), **const),         # b2
        pl.BlockSpec((1, D), lambda n, hb: (0, 0), **const),         # ln2 gamma
        pl.BlockSpec((1, D), lambda n, hb: (0, 0), **const),         # ln2 beta
    ]
    # TODO(synk): for production widths (D >= 2048) on v7x, tile the QKV/Wo
    # projections over a column/head grid axis (or split attention and FFN into two
    # pallas_calls) so the attention weights do not sit live through the FFN chunks.

    flops = N * (8 * S * D * D + 4 * S * S * D + 4 * S * D * H)
    transcendentals = N * (num_heads * S * S + 4 * S)
    bytes_accessed = (2 * N * S * D * 4                     # x in + out
                      + (4 * D * D + 2 * D * H) * 2         # bf16 weights
                      + (8 * D + H) * 4)                    # biases + LN params

    return pl.pallas_call(
        kernel,
        out_shape=jax.ShapeDtypeStruct((N, S, D), x.dtype),
        grid_spec=pltpu.PrefetchScalarGridSpec(
            num_scalar_prefetch=0,
            grid=(N, n_hb),
            in_specs=in_specs,
            out_specs=pl.BlockSpec((1, S, D), lambda n, hb: (n, 0, 0)),
            scratch_shapes=[
                pltpu.VMEM((S, D), jnp.float32),     # h1 f32 (LN2 residual)
                pltpu.VMEM((S, D), jnp.bfloat16),    # h1 bf16 (FFN matmul input)
                pltpu.VMEM((S, D), jnp.float32),     # FFN output accumulator
            ],
        ),
        compiler_params=pltpu.CompilerParams(
            dimension_semantics=("parallel", "arbitrary"),
            vmem_limit_bytes=_pick_vmem_limit(),
        ),
        cost_estimate=pl.CostEstimate(
            flops=flops, transcendentals=transcendentals,
            bytes_accessed=bytes_accessed),
    )(x, wq, bq, wk, bk, wv, bv, wo, bo, g1, be1, w1, b1, w2, b2, g2, be2)


def make_params(key, d_model):
    H = d_model * 4
    ks = jax.random.split(key, 6)
    std = 0.02

    def lin(k, fan_in, fan_out):
        w = jax.random.normal(k, (fan_in, fan_out), jnp.float32) * std
        b = jnp.zeros((1, fan_out), jnp.float32)
        return w, b

    wq, bq = lin(ks[0], d_model, d_model)
    wk, bk = lin(ks[1], d_model, d_model)
    wv, bv = lin(ks[2], d_model, d_model)
    wo, bo = lin(ks[3], d_model, d_model)
    g1 = jnp.ones((1, d_model), jnp.float32)
    be1 = jnp.zeros((1, d_model), jnp.float32)
    w1, b1 = lin(ks[4], d_model, H)
    w2, b2 = lin(ks[5], H, d_model)
    g2 = jnp.ones((1, d_model), jnp.float32)
    be2 = jnp.zeros((1, d_model), jnp.float32)
    return (wq, bq, wk, bk, wv, bv, wo, bo, g1, be1, w1, b1, w2, b2, g2, be2)


def reference(x, params, num_heads):
    # Pure-JAX reference with the same bf16-input / f32-accumulate precision choices
    # but the exact PyTorch op ordering (scale applied to the energy, exact softmax).
    (wq, bq, wk, bk, wv, bv, wo, bo,
     g1, be1, w1, b1, w2, b2, g2, be2) = params
    N, S, D = x.shape
    d_k = D // num_heads
    f32, bf = jnp.float32, jnp.bfloat16

    def ln(v, g, b, eps=1e-5):
        m = v.mean(-1, keepdims=True)
        var = ((v - m) ** 2).mean(-1, keepdims=True)
        return (v - m) * lax.rsqrt(var + eps) * g + b

    xb = x.astype(bf)
    q = jnp.einsum("nsd,de->nse", xb, wq.astype(bf), preferred_element_type=f32) + bq
    k = jnp.einsum("nsd,de->nse", xb, wk.astype(bf), preferred_element_type=f32) + bk
    v = jnp.einsum("nsd,de->nse", xb, wv.astype(bf), preferred_element_type=f32) + bv

    qh = q.reshape(N, S, num_heads, d_k).astype(bf)
    kh = k.reshape(N, S, num_heads, d_k).astype(bf)
    vh = v.reshape(N, S, num_heads, d_k).astype(bf)
    energy = jnp.einsum("nqhd,nkhd->nhqk", qh, kh, preferred_element_type=f32)
    p = jax.nn.softmax(energy / (d_k ** 0.5), axis=-1)
    ctx = jnp.einsum("nhqk,nkhd->nqhd", p.astype(bf), vh,
                     preferred_element_type=f32).reshape(N, S, D)
    attn = jnp.einsum("nsd,de->nse", ctx.astype(bf), wo.astype(bf),
                      preferred_element_type=f32) + bo

    h1 = ln(attn + x, g1, be1)
    ff = jnp.einsum("nsd,dh->nsh", h1.astype(bf), w1.astype(bf),
                    preferred_element_type=f32) + b1
    ff = jnp.maximum(ff, 0.0)
    ff = jnp.einsum("nsh,hd->nsd", ff.astype(bf), w2.astype(bf),
                    preferred_element_type=f32) + b2
    return ln(ff + h1, g2, be2)


if __name__ == "__main__":
    N, S, D, num_heads = 2, 8, 128, 4          # small, lane-dense demo shape (H = 4D = 512)
    key = jax.random.PRNGKey(0)
    kx, kp = jax.random.split(key)
    x = jax.random.normal(kx, (N, S, D), jnp.float32)
    params = make_params(kp, D)

    y = transformer_block(x, params, num_heads, h_blk=128)   # 4 FFN hidden chunks
    y = jax.block_until_ready(y)

    y_ref = reference(x, params, num_heads)
    # tolerance accounts for bf16 MXU inputs and the folded 1/sqrt(d_k) scale
    assert jnp.allclose(y, y_ref, atol=2e-2, rtol=2e-2), float(jnp.max(jnp.abs(y - y_ref)))
    print("KERNEL_OK")
</pallas_src>

<mosaic_0001>
module attributes {stable_mosaic.version = 11 : i64} {
  func.func @transformer_block_kernel(%arg0: i32, %arg1: i32, %arg2: memref<1x8x128xf32, #tpu.memory_space<vmem>>, %arg3: memref<128x128xbf16, #tpu.memory_space<vmem>>, %arg4: memref<1x128xf32, #tpu.memory_space<vmem>>, %arg5: memref<128x128xbf16, #tpu.memory_space<vmem>>, %arg6: memref<1x128xf32, #tpu.memory_space<vmem>>, %arg7: memref<128x128xbf16, #tpu.memory_space<vmem>>, %arg8: memref<1x128xf32, #tpu.memory_space<vmem>>, %arg9: memref<128x128xbf16, #tpu.memory_space<vmem>>, %arg10: memref<1x128xf32, #tpu.memory_space<vmem>>, %arg11: memref<1x128xf32, #tpu.memory_space<vmem>>, %arg12: memref<1x128xf32, #tpu.memory_space<vmem>>, %arg13: memref<128x128xbf16, #tpu.memory_space<vmem>>, %arg14: memref<1x128xf32, #tpu.memory_space<vmem>>, %arg15: memref<128x128xbf16, #tpu.memory_space<vmem>>, %arg16: memref<1x128xf32, #tpu.memory_space<vmem>>, %arg17: memref<1x128xf32, #tpu.memory_space<vmem>>, %arg18: memref<1x128xf32, #tpu.memory_space<vmem>>, %arg19: memref<1x8x128xf32, #tpu.memory_space<vmem>>, %arg20: memref<8x128xf32, #tpu.memory_space<vmem>>, %arg21: memref<8x128xbf16, #tpu.memory_space<vmem>>, %arg22: memref<8x128xf32, #tpu.memory_space<vmem>>) attributes {dimension_semantics = [#tpu.dimension_semantics<parallel>, #tpu.dimension_semantics<arbitrary>], iteration_bounds = array<i64: 2, 4>, scalar_prefetch = 0 : i64, scratch_operands = 3 : i64, tpu.core_type = #tpu.core_type<tc>, window_params = [{transform_indices = @transform_0, window_bounds = array<i64: 1, 8, 128>}, {pipeline_mode = #tpu.pipeline_mode<synchronous>, transform_indices = @transform_1, window_bounds = array<i64: 128, 128>}, {pipeline_mode = #tpu.pipeline_mode<synchronous>, transform_indices = @transform_2, window_bounds = array<i64: 1, 128>}, {pipeline_mode = #tpu.pipeline_mode<synchronous>, transform_indices = @transform_3, window_bounds = array<i64: 128, 128>}, {pipeline_mode = #tpu.pipeline_mode<synchronous>, transform_indices = @transform_4, window_bounds = array<i64: 1, 128>}, {pipeline_mode = #tpu.pipeline_mode<synchronous>, transform_indices = @transform_5, window_bounds = array<i64: 128, 128>}, {pipeline_mode = #tpu.pipeline_mode<synchronous>, transform_indices = @transform_6, window_bounds = array<i64: 1, 128>}, {pipeline_mode = #tpu.pipeline_mode<synchronous>, transform_indices = @transform_7, window_bounds = array<i64: 128, 128>}, {pipeline_mode = #tpu.pipeline_mode<synchronous>, transform_indices = @transform_8, window_bounds = array<i64: 1, 128>}, {pipeline_mode = #tpu.pipeline_mode<synchronous>, transform_indices = @transform_9, window_bounds = array<i64: 1, 128>}, {pipeline_mode = #tpu.pipeline_mode<synchronous>, transform_indices = @transform_10, window_bounds = array<i64: 1, 128>}, {transform_indices = @transform_11, window_bounds = array<i64: 128, 128>}, {transform_indices = @transform_12, window_bounds = array<i64: 1, 128>}, {transform_indices = @transform_13, window_bounds = array<i64: 128, 128>}, {pipeline_mode = #tpu.pipeline_mode<synchronous>, transform_indices = @transform_14, window_bounds = array<i64: 1, 128>}, {pipeline_mode = #tpu.pipeline_mode<synchronous>, transform_indices = @transform_15, window_bounds = array<i64: 1, 128>}, {pipeline_mode = #tpu.pipeline_mode<synchronous>, transform_indices = @transform_16, window_bounds = array<i64: 1, 128>}, {transform_indices = @transform_17, window_bounds = array<i64: 1, 8, 128>}]} {
    %c0_i32 = arith.constant 0 : i32
    %0 = arith.cmpi eq, %arg1, %c0_i32 : i32
    %1 = arith.extui %0 : i1 to i32
    %c0_i32_0 = arith.constant 0 : i32
    %2 = arith.cmpi ne, %1, %c0_i32_0 : i32
    scf.if %2 {
      %c0_15 = arith.constant 0 : index
      %c0_16 = arith.constant 0 : index
      %c0_17 = arith.constant 0 : index
      %20 = vector.load %arg2[%c0_15, %c0_16, %c0_17] : memref<1x8x128xf32, #tpu.memory_space<vmem>>, vector<1x8x128xf32>
      %21 = vector.shape_cast %20 : vector<1x8x128xf32> to vector<8x128xf32>
      %22 = arith.truncf %21 : vector<8x128xf32> to vector<8x128xbf16>
      %c0_18 = arith.constant 0 : index
      %c0_19 = arith.constant 0 : index
      %23 = vector.load %arg3[%c0_18, %c0_19] : memref<128x128xbf16, #tpu.memory_space<vmem>>, vector<128x128xbf16>
      %cst_20 = arith.constant dense<0.000000e+00> : vector<8x128xf32>
      %24 = tpu.matmul %22, %23, %cst_20 {dimension_numbers = #tpu.dot_dimension_numbers<[1], [0], [0], [1], [0, 0, 1, 1], [], []>} : vector<8x128xbf16>, vector<128x128xbf16>, vector<8x128xf32> -> vector<8x128xf32>
      %c0_21 = arith.constant 0 : index
      %c0_22 = arith.constant 0 : index
      %25 = vector.load %arg4[%c0_21, %c0_22] : memref<1x128xf32, #tpu.memory_space<vmem>>, vector<1x128xf32>
      %26 = vector.broadcast %25 : vector<1x128xf32> to vector<8x128xf32>
      %27 = arith.addf %24, %26 : vector<8x128xf32>
      %28 = arith.truncf %27 : vector<8x128xf32> to vector<8x128xbf16>
      %c0_23 = arith.constant 0 : index
      %c0_24 = arith.constant 0 : index
      %29 = vector.load %arg5[%c0_23, %c0_24] : memref<128x128xbf16, #tpu.memory_space<vmem>>, vector<128x128xbf16>
      %cst_25 = arith.constant dense<0.000000e+00> : vector<8x128xf32>
      %30 = tpu.matmul %22, %29, %cst_25 {dimension_numbers = #tpu.dot_dimension_numbers<[1], [0], [0], [1], [0, 0, 1, 1], [], []>} : vector<8x128xbf16>, vector<128x128xbf16>, vector<8x128xf32> -> vector<8x128xf32>
      %c0_26 = arith.constant 0 : index
      %c0_27 = arith.constant 0 : index
      %31 = vector.load %arg6[%c0_26, %c0_27] : memref<1x128xf32, #tpu.memory_space<vmem>>, vector<1x128xf32>
      %32 = vector.broadcast %31 : vector<1x128xf32> to vector<8x128xf32>
      %33 = arith.addf %30, %32 : vector<8x128xf32>
      %34 = arith.truncf %33 : vector<8x128xf32> to vector<8x128xbf16>
      %c0_28 = arith.constant 0 : index
      %c0_29 = arith.constant 0 : index
      %35 = vector.load %arg7[%c0_28, %c0_29] : memref<128x128xbf16, #tpu.memory_space<vmem>>, vector<128x128xbf16>
      %cst_30 = arith.constant dense<0.000000e+00> : vector<8x128xf32>
      %36 = tpu.matmul %22, %35, %cst_30 {dimension_numbers = #tpu.dot_dimension_numbers<[1], [0], [0], [1], [0, 0, 1, 1], [], []>} : vector<8x128xbf16>, vector<128x128xbf16>, vector<8x128xf32> -> vector<8x128xf32>
      %c0_31 = arith.constant 0 : index
      %c0_32 = arith.constant 0 : index
      %37 = vector.load %arg8[%c0_31, %c0_32] : memref<1x128xf32, #tpu.memory_space<vmem>>, vector<1x128xf32>
      %38 = vector.broadcast %37 : vector<1x128xf32> to vector<8x128xf32>
      %39 = arith.addf %36, %38 : vector<8x128xf32>
      %40 = arith.truncf %39 : vector<8x128xf32> to vector<8x128xbf16>
      %41 = vector.extract_strided_slice %28 {offsets = [0, 0], sizes = [8, 32], strides = [1, 1]} : vector<8x128xbf16> to vector<8x32xbf16>
      %42 = vector.extract_strided_slice %34 {offsets = [0, 0], sizes = [8, 32], strides = [1, 1]} : vector<8x128xbf16> to vector<8x32xbf16>
      %43 = vector.extract_strided_slice %40 {offsets = [0, 0], sizes = [8, 32], strides = [1, 1]} : vector<8x128xbf16> to vector<8x32xbf16>
      %cst_33 = arith.constant dense<0.000000e+00> : vector<8x8xf32>
      %44 = tpu.matmul %41, %42, %cst_33 {dimension_numbers = #tpu.dot_dimension_numbers<[1], [1], [0], [0], [0, 0, 1, 0], [], []>} : vector<8x32xbf16>, vector<8x32xbf16>, vector<8x8xf32> -> vector<8x8xf32>
      %cst_34 = arith.constant dense<0xFF800000> : vector<8xf32>
      %45 = vector.multi_reduction <maximumf>, %44, %cst_34 [1] : vector<8x8xf32> to vector<8xf32>
      %46 = vector.shape_cast %45 : vector<8xf32> to vector<8x1xf32>
      %47 = vector.broadcast %46 : vector<8x1xf32> to vector<8x8xf32>
      %48 = arith.subf %44, %47 : vector<8x8xf32>
      %49 = math.exp %48 : vector<8x8xf32>
      %cst_35 = arith.constant dense<0.000000e+00> : vector<8xf32>
      %50 = vector.multi_reduction <add>, %49, %cst_35 [1] : vector<8x8xf32> to vector<8xf32>
      %51 = vector.shape_cast %50 : vector<8xf32> to vector<8x1xf32>
      %52 = tpu.reciprocal %51 : vector<8x1xf32> -> vector<8x1xf32>
      %53 = vector.broadcast %52 : vector<8x1xf32> to vector<8x8xf32>
      %54 = arith.mulf %49, %53 : vector<8x8xf32>
      %55 = arith.truncf %54 : vector<8x8xf32> to vector<8x8xbf16>
      %cst_36 = arith.constant dense<0.000000e+00> : vector<8x32xf32>
      %56 = tpu.matmul %55, %43, %cst_36 {dimension_numbers = #tpu.dot_dimension_numbers<[1], [0], [0], [1], [0, 0, 1, 1], [], []>} : vector<8x8xbf16>, vector<8x32xbf16>, vector<8x32xf32> -> vector<8x32xf32>
      %57 = vector.extract_strided_slice %28 {offsets = [0, 32], sizes = [8, 32], strides = [1, 1]} : vector<8x128xbf16> to vector<8x32xbf16>
      %58 = vector.extract_strided_slice %34 {offsets = [0, 32], sizes = [8, 32], strides = [1, 1]} : vector<8x128xbf16> to vector<8x32xbf16>
      %59 = vector.extract_strided_slice %40 {offsets = [0, 32], sizes = [8, 32], strides = [1, 1]} : vector<8x128xbf16> to vector<8x32xbf16>
      %cst_37 = arith.constant dense<0.000000e+00> : vector<8x8xf32>
      %60 = tpu.matmul %57, %58, %cst_37 {dimension_numbers = #tpu.dot_dimension_numbers<[1], [1], [0], [0], [0, 0, 1, 0], [], []>} : vector<8x32xbf16>, vector<8x32xbf16>, vector<8x8xf32> -> vector<8x8xf32>
      %cst_38 = arith.constant dense<0xFF800000> : vector<8xf32>
      %61 = vector.multi_reduction <maximumf>, %60, %cst_38 [1] : vector<8x8xf32> to vector<8xf32>
      %62 = vector.shape_cast %61 : vector<8xf32> to vector<8x1xf32>
      %63 = vector.broadcast %62 : vector<8x1xf32> to vector<8x8xf32>
      %64 = arith.subf %60, %63 : vector<8x8xf32>
      %65 = math.exp %64 : vector<8x8xf32>
      %cst_39 = arith.constant dense<0.000000e+00> : vector<8xf32>
      %66 = vector.multi_reduction <add>, %65, %cst_39 [1] : vector<8x8xf32> to vector<8xf32>
      %67 = vector.shape_cast %66 : vector<8xf32> to vector<8x1xf32>
      %68 = tpu.reciprocal %67 : vector<8x1xf32> -> vector<8x1xf32>
      %69 = vector.broadcast %68 : vector<8x1xf32> to vector<8x8xf32>
      %70 = arith.mulf %65, %69 : vector<8x8xf32>
      %71 = arith.truncf %70 : vector<8x8xf32> to vector<8x8xbf16>
      %cst_40 = arith.constant dense<0.000000e+00> : vector<8x32xf32>
      %72 = tpu.matmul %71, %59, %cst_40 {dimension_numbers = #tpu.dot_dimension_numbers<[1], [0], [0], [1], [0, 0, 1, 1], [], []>} : vector<8x8xbf16>, vector<8x32xbf16>, vector<8x32xf32> -> vector<8x32xf32>
      %73 = vector.extract_strided_slice %28 {offsets = [0, 64], sizes = [8, 32], strides = [1, 1]} : vector<8x128xbf16> to vector<8x32xbf16>
      %74 = vector.extract_strided_slice %34 {offsets = [0, 64], sizes = [8, 32], strides = [1, 1]} : vector<8x128xbf16> to vector<8x32xbf16>
      %75 = vector.extract_strided_slice %40 {offsets = [0, 64], sizes = [8, 32], strides = [1, 1]} : vector<8x128xbf16> to vector<8x32xbf16>
      %cst_41 = arith.constant dense<0.000000e+00> : vector<8x8xf32>
      %76 = tpu.matmul %73, %74, %cst_41 {dimension_numbers = #tpu.dot_dimension_numbers<[1], [1], [0], [0], [0, 0, 1, 0], [], []>} : vector<8x32xbf16>, vector<8x32xbf16>, vector<8x8xf32> -> vector<8x8xf32>
      %cst_42 = arith.constant dense<0xFF800000> : vector<8xf32>
      %77 = vector.multi_reduction <maximumf>, %76, %cst_42 [1] : vector<8x8xf32> to vector<8xf32>
      %78 = vector.shape_cast %77 : vector<8xf32> to vector<8x1xf32>
      %79 = vector.broadcast %78 : vector<8x1xf32> to vector<8x8xf32>
      %80 = arith.subf %76, %79 : vector<8x8xf32>
      %81 = math.exp %80 : vector<8x8xf32>
      %cst_43 = arith.constant dense<0.000000e+00> : vector<8xf32>
      %82 = vector.multi_reduction <add>, %81, %cst_43 [1] : vector<8x8xf32> to vector<8xf32>
      %83 = vector.shape_cast %82 : vector<8xf32> to vector<8x1xf32>
      %84 = tpu.reciprocal %83 : vector<8x1xf32> -> vector<8x1xf32>
      %85 = vector.broadcast %84 : vector<8x1xf32> to vector<8x8xf32>
      %86 = arith.mulf %81, %85 : vector<8x8xf32>
      %87 = arith.truncf %86 : vector<8x8xf32> to vector<8x8xbf16>
      %cst_44 = arith.constant dense<0.000000e+00> : vector<8x32xf32>
      %88 = tpu.matmul %87, %75, %cst_44 {dimension_numbers = #tpu.dot_dimension_numbers<[1], [0], [0], [1], [0, 0, 1, 1], [], []>} : vector<8x8xbf16>, vector<8x32xbf16>, vector<8x32xf32> -> vector<8x32xf32>
      %89 = vector.extract_strided_slice %28 {offsets = [0, 96], sizes = [8, 32], strides = [1, 1]} : vector<8x128xbf16> to vector<8x32xbf16>
      %90 = vector.extract_strided_slice %34 {offsets = [0, 96], sizes = [8, 32], strides = [1, 1]} : vector<8x128xbf16> to vector<8x32xbf16>
      %91 = vector.extract_strided_slice %40 {offsets = [0, 96], sizes = [8, 32], strides = [1, 1]} : vector<8x128xbf16> to vector<8x32xbf16>
      %cst_45 = arith.constant dense<0.000000e+00> : vector<8x8xf32>
      %92 = tpu.matmul %89, %90, %cst_45 {dimension_numbers = #tpu.dot_dimension_numbers<[1], [1], [0], [0], [0, 0, 1, 0], [], []>} : vector<8x32xbf16>, vector<8x32xbf16>, vector<8x8xf32> -> vector<8x8xf32>
      %cst_46 = arith.constant dense<0xFF800000> : vector<8xf32>
      %93 = vector.multi_reduction <maximumf>, %92, %cst_46 [1] : vector<8x8xf32> to vector<8xf32>
      %94 = vector.shape_cast %93 : vector<8xf32> to vector<8x1xf32>
      %95 = vector.broadcast %94 : vector<8x1xf32> to vector<8x8xf32>
      %96 = arith.subf %92, %95 : vector<8x8xf32>
      %97 = math.exp %96 : vector<8x8xf32>
      %cst_47 = arith.constant dense<0.000000e+00> : vector<8xf32>
      %98 = vector.multi_reduction <add>, %97, %cst_47 [1] : vector<8x8xf32> to vector<8xf32>
      %99 = vector.shape_cast %98 : vector<8xf32> to vector<8x1xf32>
      %100 = tpu.reciprocal %99 : vector<8x1xf32> -> vector<8x1xf32>
      %101 = vector.broadcast %100 : vector<8x1xf32> to vector<8x8xf32>
      %102 = arith.mulf %97, %101 : vector<8x8xf32>
      %103 = arith.truncf %102 : vector<8x8xf32> to vector<8x8xbf16>
      %cst_48 = arith.constant dense<0.000000e+00> : vector<8x32xf32>
      %104 = tpu.matmul %103, %91, %cst_48 {dimension_numbers = #tpu.dot_dimension_numbers<[1], [0], [0], [1], [0, 0, 1, 1], [], []>} : vector<8x8xbf16>, vector<8x32xbf16>, vector<8x32xf32> -> vector<8x32xf32>
      %105 = tpu.concatenate %56, %72, %88, %104 in 1 : vector<8x32xf32>, vector<8x32xf32>, vector<8x32xf32>, vector<8x32xf32> -> vector<8x128xf32>
      %106 = arith.truncf %105 : vector<8x128xf32> to vector<8x128xbf16>
      %c0_49 = arith.constant 0 : index
      %c0_50 = arith.constant 0 : index
      %107 = vector.load %arg9[%c0_49, %c0_50] : memref<128x128xbf16, #tpu.memory_space<vmem>>, vector<128x128xbf16>
      %cst_51 = arith.constant dense<0.000000e+00> : vector<8x128xf32>
      %108 = tpu.matmul %106, %107, %cst_51 {dimension_numbers = #tpu.dot_dimension_numbers<[1], [0], [0], [1], [0, 0, 1, 1], [], []>} : vector<8x128xbf16>, vector<128x128xbf16>, vector<8x128xf32> -> vector<8x128xf32>
      %c0_52 = arith.constant 0 : index
      %c0_53 = arith.constant 0 : index
      %109 = vector.load %arg10[%c0_52, %c0_53] : memref<1x128xf32, #tpu.memory_space<vmem>>, vector<1x128xf32>
      %110 = vector.broadcast %109 : vector<1x128xf32> to vector<8x128xf32>
      %111 = arith.addf %108, %110 : vector<8x128xf32>
      %112 = arith.addf %111, %21 : vector<8x128xf32>
      %c0_54 = arith.constant 0 : index
      %c0_55 = arith.constant 0 : index
      %113 = vector.load %arg11[%c0_54, %c0_55] : memref<1x128xf32, #tpu.memory_space<vmem>>, vector<1x128xf32>
      %c0_56 = arith.constant 0 : index
      %c0_57 = arith.constant 0 : index
      %114 = vector.load %arg12[%c0_56, %c0_57] : memref<1x128xf32, #tpu.memory_space<vmem>>, vector<1x128xf32>
      %cst_58 = arith.constant dense<0.000000e+00> : vector<8xf32>
      %115 = vector.multi_reduction <add>, %112, %cst_58 [1] : vector<8x128xf32> to vector<8xf32>
      %116 = vector.shape_cast %115 : vector<8xf32> to vector<8x1xf32>
      %cst_59 = arith.constant 1.280000e+02 : f32
      %117 = vector.broadcast %cst_59 : f32 to vector<8x1xf32>
      %118 = arith.divf %116, %117 : vector<8x1xf32>
      %119 = vector.broadcast %118 : vector<8x1xf32> to vector<8x128xf32>
      %120 = arith.subf %112, %119 : vector<8x128xf32>
      %121 = arith.mulf %120, %120 : vector<8x128xf32>
      %cst_60 = arith.constant dense<0.000000e+00> : vector<8xf32>
      %122 = vector.multi_reduction <add>, %121, %cst_60 [1] : vector<8x128xf32> to vector<8xf32>
      %123 = vector.shape_cast %122 : vector<8xf32> to vector<8x1xf32>
      %cst_61 = arith.constant 1.280000e+02 : f32
      %124 = vector.broadcast %cst_61 : f32 to vector<8x1xf32>
      %125 = arith.divf %123, %124 : vector<8x1xf32>
      %cst_62 = arith.constant 9.99999974E-6 : f32
      %126 = vector.broadcast %cst_62 : f32 to vector<8x1xf32>
      %127 = arith.addf %125, %126 : vector<8x1xf32>
      %128 = math.rsqrt %127 : vector<8x1xf32>
      %129 = vector.broadcast %128 : vector<8x1xf32> to vector<8x128xf32>
      %130 = arith.mulf %120, %129 : vector<8x128xf32>
      %131 = vector.broadcast %113 : vector<1x128xf32> to vector<8x128xf32>
      %132 = arith.mulf %130, %131 : vector<8x128xf32>
      %133 = vector.broadcast %114 : vector<1x128xf32> to vector<8x128xf32>
      %134 = arith.addf %132, %133 : vector<8x128xf32>
      %c0_63 = arith.constant 0 : index
      %c0_64 = arith.constant 0 : index
      %135 = vector.load %arg20[%c0_63, %c0_64] : memref<8x128xf32, #tpu.memory_space<vmem>>, vector<8x128xf32>
      tpu.vector_store %arg20[%c0_63, %c0_64], %134 {strides = array<i32>} : memref<8x128xf32, #tpu.memory_space<vmem>>, vector<8x128xf32>,
      %136 = arith.truncf %134 : vector<8x128xf32> to vector<8x128xbf16>
      %c0_65 = arith.constant 0 : index
      %c0_66 = arith.constant 0 : index
      %137 = vector.load %arg21[%c0_65, %c0_66] : memref<8x128xbf16, #tpu.memory_space<vmem>>, vector<8x128xbf16>
      tpu.vector_store %arg21[%c0_65, %c0_66], %136 {strides = array<i32>} : memref<8x128xbf16, #tpu.memory_space<vmem>>, vector<8x128xbf16>,
      %cst_67 = arith.constant 0.000000e+00 : f32
      %138 = vector.broadcast %cst_67 : f32 to vector<8x128xf32>
      %c0_68 = arith.constant 0 : index
      %c0_69 = arith.constant 0 : index
      %139 = vector.load %arg22[%c0_68, %c0_69] : memref<8x128xf32, #tpu.memory_space<vmem>>, vector<8x128xf32>
      tpu.vector_store %arg22[%c0_68, %c0_69], %138 {strides = array<i32>} : memref<8x128xf32, #tpu.memory_space<vmem>>, vector<8x128xf32>,
    } else {
    }
    %c0 = arith.constant 0 : index
    %c0_1 = arith.constant 0 : index
    %3 = vector.load %arg21[%c0, %c0_1] : memref<8x128xbf16, #tpu.memory_space<vmem>>, vector<8x128xbf16>
    %c0_2 = arith.constant 0 : index
    %c0_3 = arith.constant 0 : index
    %4 = vector.load %arg13[%c0_2, %c0_3] : memref<128x128xbf16, #tpu.memory_space<vmem>>, vector<128x128xbf16>
    %cst = arith.constant dense<0.000000e+00> : vector<8x128xf32>
    %5 = tpu.matmul %3, %4, %cst {dimension_numbers = #tpu.dot_dimension_numbers<[1], [0], [0], [1], [0, 0, 1, 1], [], []>} : vector<8x128xbf16>, vector<128x128xbf16>, vector<8x128xf32> -> vector<8x128xf32>
    %c0_4 = arith.constant 0 : index
    %c0_5 = arith.constant 0 : index
    %6 = vector.load %arg14[%c0_4, %c0_5] : memref<1x128xf32, #tpu.memory_space<vmem>>, vector<1x128xf32>
    %7 = vector.broadcast %6 : vector<1x128xf32> to vector<8x128xf32>
    %8 = arith.addf %5, %7 : vector<8x128xf32>
    %cst_6 = arith.constant 0.000000e+00 : f32
    %9 = vector.broadcast %cst_6 : f32 to vector<8x128xf32>
    %10 = arith.maximumf %8, %9 : vector<8x128xf32>
    %c0_7 = arith.constant 0 : index
    %c0_8 = arith.constant 0 : index
    %11 = vector.load %arg22[%c0_7, %c0_8] : memref<8x128xf32, #tpu.memory_space<vmem>>, vector<8x128xf32>
    %12 = arith.truncf %10 : vector<8x128xf32> to vector<8x128xbf16>
    %c0_9 = arith.constant 0 : index
    %c0_10 = arith.constant 0 : index
    %13 = vector.load %arg15[%c0_9, %c0_10] : memref<128x128xbf16, #tpu.memory_space<vmem>>, vector<128x128xbf16>
    %cst_11 = arith.constant dense<0.000000e+00> : vector<8x128xf32>
    %14 = tpu.matmul %12, %13, %cst_11 {dimension_numbers = #tpu.dot_dimension_numbers<[1], [0], [0], [1], [0, 0, 1, 1], [], []>} : vector<8x128xbf16>, vector<128x128xbf16>, vector<8x128xf32> -> vector<8x128xf32>
    %15 = arith.addf %11, %14 : vector<8x128xf32>
    %c0_12 = arith.constant 0 : index
    %c0_13 = arith.constant 0 : index
    %16 = vector.load %arg22[%c0_12, %c0_13] : memref<8x128xf32, #tpu.memory_space<vmem>>, vector<8x128xf32>
    tpu.vector_store %arg22[%c0_12, %c0_13], %15 {strides = array<i32>} : memref<8x128xf32, #tpu.memory_space<vmem>>, vector<8x128xf32>,
    %c3_i32 = arith.constant 3 : i32
    %17 = arith.cmpi eq, %arg1, %c3_i32 : i32
    %18 = arith.extui %17 : i1 to i32
    %c0_i32_14 = arith.constant 0 : i32
    %19 = arith.cmpi ne, %18, %c0_i32_14 : i32
    scf.if %19 {
      %c0_15 = arith.constant 0 : index
      %c0_16 = arith.constant 0 : index
      %20 = vector.load %arg22[%c0_15, %c0_16] : memref<8x128xf32, #tpu.memory_space<vmem>>, vector<8x128xf32>
      %c0_17 = arith.constant 0 : index
      %c0_18 = arith.constant 0 : index
      %21 = vector.load %arg16[%c0_17, %c0_18] : memref<1x128xf32, #tpu.memory_space<vmem>>, vector<1x128xf32>
      %22 = vector.broadcast %21 : vector<1x128xf32> to vector<8x128xf32>
      %23 = arith.addf %20, %22 : vector<8x128xf32>
      %c0_19 = arith.constant 0 : index
      %c0_20 = arith.constant 0 : index
      %24 = vector.load %arg20[%c0_19, %c0_20] : memref<8x128xf32, #tpu.memory_space<vmem>>, vector<8x128xf32>
      %25 = arith.addf %23, %24 : vector<8x128xf32>
      %c0_21 = arith.constant 0 : index
      %c0_22 = arith.constant 0 : index
      %26 = vector.load %arg17[%c0_21, %c0_22] : memref<1x128xf32, #tpu.memory_space<vmem>>, vector<1x128xf32>
      %c0_23 = arith.constant 0 : index
      %c0_24 = arith.constant 0 : index
      %27 = vector.load %arg18[%c0_23, %c0_24] : memref<1x128xf32, #tpu.memory_space<vmem>>, vector<1x128xf32>
      %cst_25 = arith.constant dense<0.000000e+00> : vector<8xf32>
      %28 = vector.multi_reduction <add>, %25, %cst_25 [1] : vector<8x128xf32> to vector<8xf32>
      %29 = vector.shape_cast %28 : vector<8xf32> to vector<8x1xf32>
      %cst_26 = arith.constant 1.280000e+02 : f32
      %30 = vector.broadcast %cst_26 : f32 to vector<8x1xf32>
      %31 = arith.divf %29, %30 : vector<8x1xf32>
      %32 = vector.broadcast %31 : vector<8x1xf32> to vector<8x128xf32>
      %33 = arith.subf %25, %32 : vector<8x128xf32>
      %34 = arith.mulf %33, %33 : vector<8x128xf32>
      %cst_27 = arith.constant dense<0.000000e+00> : vector<8xf32>
      %35 = vector.multi_reduction <add>, %34, %cst_27 [1] : vector<8x128xf32> to vector<8xf32>
      %36 = vector.shape_cast %35 : vector<8xf32> to vector<8x1xf32>
      %cst_28 = arith.constant 1.280000e+02 : f32
      %37 = vector.broadcast %cst_28 : f32 to vector<8x1xf32>
      %38 = arith.divf %36, %37 : vector<8x1xf32>
      %cst_29 = arith.constant 9.99999974E-6 : f32
      %39 = vector.broadcast %cst_29 : f32 to vector<8x1xf32>
      %40 = arith.addf %38, %39 : vector<8x1xf32>
      %41 = math.rsqrt %40 : vector<8x1xf32>
      %42 = vector.broadcast %41 : vector<8x1xf32> to vector<8x128xf32>
      %43 = arith.mulf %33, %42 : vector<8x128xf32>
      %44 = vector.broadcast %26 : vector<1x128xf32> to vector<8x128xf32>
      %45 = arith.mulf %43, %44 : vector<8x128xf32>
      %46 = vector.broadcast %27 : vector<1x128xf32> to vector<8x128xf32>
      %47 = arith.addf %45, %46 : vector<8x128xf32>
      %c0_30 = arith.constant 0 : index
      %c0_31 = arith.constant 0 : index
      %c0_32 = arith.constant 0 : index
      %48 = vector.load %arg19[%c0_30, %c0_31, %c0_32] : memref<1x8x128xf32, #tpu.memory_space<vmem>>, vector<1x8x128xf32>
      %49 = vector.shape_cast %48 : vector<1x8x128xf32> to vector<8x128xf32>
      %50 = vector.shape_cast %47 : vector<8x128xf32> to vector<1x8x128xf32>
      tpu.vector_store %arg19[%c0_30, %c0_31, %c0_32], %50 {strides = array<i32>} : memref<1x8x128xf32, #tpu.memory_space<vmem>>, vector<1x8x128xf32>,
    } else {
    }
    return
  }
  func.func @transform_0(%arg0: i32, %arg1: i32) -> (i32, i32, i32) {
    %c0_i32 = arith.constant 0 : i32
    %c0_i32_0 = arith.constant 0 : i32
    %c0_i32_1 = arith.constant 0 : i32
    return %arg0, %c0_i32, %c0_i32_0 : i32, i32, i32
  }
  func.func @transform_1(%arg0: i32, %arg1: i32) -> (i32, i32) {
    %c0_i32 = arith.constant 0 : i32
    %c0_i32_0 = arith.constant 0 : i32
    %c0_i32_1 = arith.constant 0 : i32
    return %c0_i32, %c0_i32_0 : i32, i32
  }
  func.func @transform_2(%arg0: i32, %arg1: i32) -> (i32, i32) {
    %c0_i32 = arith.constant 0 : i32
    %c0_i32_0 = arith.constant 0 : i32
    %c0_i32_1 = arith.constant 0 : i32
    return %c0_i32, %c0_i32_0 : i32, i32
  }
  func.func @transform_3(%arg0: i32, %arg1: i32) -> (i32, i32) {
    %c0_i32 = arith.constant 0 : i32
    %c0_i32_0 = arith.constant 0 : i32
    %c0_i32_1 = arith.constant 0 : i32
    return %c0_i32, %c0_i32_0 : i32, i32
  }
  func.func @transform_4(%arg0: i32, %arg1: i32) -> (i32, i32) {
    %c0_i32 = arith.constant 0 : i32
    %c0_i32_0 = arith.constant 0 : i32
    %c0_i32_1 = arith.constant 0 : i32
    return %c0_i32, %c0_i32_0 : i32, i32
  }
  func.func @transform_5(%arg0: i32, %arg1: i32) -> (i32, i32) {
    %c0_i32 = arith.constant 0 : i32
    %c0_i32_0 = arith.constant 0 : i32
    %c0_i32_1 = arith.constant 0 : i32
    return %c0_i32, %c0_i32_0 : i32, i32
  }
  func.func @transform_6(%arg0: i32, %arg1: i32) -> (i32, i32) {
    %c0_i32 = arith.constant 0 : i32
    %c0_i32_0 = arith.constant 0 : i32
    %c0_i32_1 = arith.constant 0 : i32
    return %c0_i32, %c0_i32_0 : i32, i32
  }
  func.func @transform_7(%arg0: i32, %arg1: i32) -> (i32, i32) {
    %c0_i32 = arith.constant 0 : i32
    %c0_i32_0 = arith.constant 0 : i32
    %c0_i32_1 = arith.constant 0 : i32
    return %c0_i32, %c0_i32_0 : i32, i32
  }
  func.func @transform_8(%arg0: i32, %arg1: i32) -> (i32, i32) {
    %c0_i32 = arith.constant 0 : i32
    %c0_i32_0 = arith.constant 0 : i32
    %c0_i32_1 = arith.constant 0 : i32
    return %c0_i32, %c0_i32_0 : i32, i32
  }
  func.func @transform_9(%arg0: i32, %arg1: i32) -> (i32, i32) {
    %c0_i32 = arith.constant 0 : i32
    %c0_i32_0 = arith.constant 0 : i32
    %c0_i32_1 = arith.constant 0 : i32
    return %c0_i32, %c0_i32_0 : i32, i32
  }
  func.func @transform_10(%arg0: i32, %arg1: i32) -> (i32, i32) {
    %c0_i32 = arith.constant 0 : i32
    %c0_i32_0 = arith.constant 0 : i32
    %c0_i32_1 = arith.constant 0 : i32
    return %c0_i32, %c0_i32_0 : i32, i32
  }
  func.func @transform_11(%arg0: i32, %arg1: i32) -> (i32, i32) {
    %c0_i32 = arith.constant 0 : i32
    %c0_i32_0 = arith.constant 0 : i32
    return %c0_i32, %arg1 : i32, i32
  }
  func.func @transform_12(%arg0: i32, %arg1: i32) -> (i32, i32) {
    %c0_i32 = arith.constant 0 : i32
    %c0_i32_0 = arith.constant 0 : i32
    return %c0_i32, %arg1 : i32, i32
  }
  func.func @transform_13(%arg0: i32, %arg1: i32) -> (i32, i32) {
    %c0_i32 = arith.constant 0 : i32
    %c0_i32_0 = arith.constant 0 : i32
    return %arg1, %c0_i32 : i32, i32
  }
  func.func @transform_14(%arg0: i32, %arg1: i32) -> (i32, i32) {
    %c0_i32 = arith.constant 0 : i32
    %c0_i32_0 = arith.constant 0 : i32
    %c0_i32_1 = arith.constant 0 : i32
    return %c0_i32, %c0_i32_0 : i32, i32
  }
  func.func @transform_15(%arg0: i32, %arg1: i32) -> (i32, i32) {
    %c0_i32 = arith.constant 0 : i32
    %c0_i32_0 = arith.constant 0 : i32
    %c0_i32_1 = arith.constant 0 : i32
    return %c0_i32, %c0_i32_0 : i32, i32
  }
  func.func @transform_16(%arg0: i32, %arg1: i32) -> (i32, i32) {
    %c0_i32 = arith.constant 0 : i32
    %c0_i32_0 = arith.constant 0 : i32
    %c0_i32_1 = arith.constant 0 : i32
    return %c0_i32, %c0_i32_0 : i32, i32
  }
  func.func @transform_17(%arg0: i32, %arg1: i32) -> (i32, i32, i32) {
    %c0_i32 = arith.constant 0 : i32
    %c0_i32_0 = arith.constant 0 : i32
    %c0_i32_1 = arith.constant 0 : i32
    return %arg0, %c0_i32, %c0_i32_0 : i32, i32, i32
  }
}

</mosaic_0001>

<bundles_post_ra>
// kernel: tpu_custom_call.1
= control target key start
LH: loop header
LB: loop body
LE: loop exit
PB: predicated region body
PF: predicated region fallthrough
CT: control target
= control target key end

     0   :  { %s3778_s0 = inlined_call_operand.hbm [shape: f32[2,8,128], index: 0, kind: input, shape index: {}]   ;;  %s3779_s1 = inlined_call_operand.hbm [shape: bf16[128,128], index: 1, kind: input, shape index: {}]   ;;  %s3780_s2 = inlined_call_operand.vmem [shape: f32[1,128], index: 2, kind: input, shape index: {}]   ;;  %s3781_s3 = inlined_call_operand.hbm [shape: bf16[128,128], index: 3, kind: input, shape index: {}]   ;;  %s3782_s4 = inlined_call_operand.vmem [shape: f32[1,128], index: 4, kind: input, shape index: {}]   ;;  %s3783_s5 = inlined_call_operand.hbm [shape: bf16[128,128], index: 5, kind: input, shape index: {}]   ;;  %s3784_s6 = inlined_call_operand.vmem [shape: f32[1,128], index: 6, kind: input, shape index: {}]   ;;  %s3785_s7 = inlined_call_operand.hbm [shape: bf16[128,128], index: 7, kind: input, shape index: {}]   ;;  %s3786_s8 = inlined_call_operand.vmem [shape: f32[1,128], index: 8, kind: input, shape index: {}]   ;;  %s3787_s9 = inlined_call_operand.vmem [shape: f32[1,128], index: 9, kind: input, shape index: {}]   ;;  %s3788_s10 = inlined_call_operand.vmem [shape: f32[1,128], index: 10, kind: input, shape index: {}]   ;;  %s3789_s11 = inlined_call_operand.hbm [shape: bf16[128,512], index: 11, kind: input, shape index: {}]   ;;  %s3790_s12 = inlined_call_operand.vmem [shape: f32[1,512], index: 12, kind: input, shape index: {}]   ;;  %s3791_s13 = inlined_call_operand.hbm [shape: bf16[512,128], index: 13, kind: input, shape index: {}]   ;;  %s3792_s14 = inlined_call_operand.vmem [shape: f32[1,128], index: 14, kind: input, shape index: {}]   ;;  %s3793_s15 = inlined_call_operand.vmem [shape: f32[1,128], index: 15, kind: input, shape index: {}]   ;;  %s3794_s16 = inlined_call_operand.vmem [shape: f32[1,128], index: 16, kind: input, shape index: {}]   ;;  %s3795_s17 = inlined_call_operand.hbm [shape: f32[2,8,128], index: 17, kind: output, shape index: {}]  }
   0x1   :  { %3823 = sst [smem:[#allocation30_spill]] %s3778_s0 }
   0x2   :  { %3824 = sst [smem:[#allocation31_spill]] %s3779_s1 }
   0x3   :  { %3825 = sst [smem:[#allocation32_spill]] %s3780_s2 }
   0x4   :  { %3826 = sst [smem:[#allocation33_spill]] %s3781_s3 }
   0x5   :  { %3827 = sst [smem:[#allocation34_spill]] %s3782_s4 }
   0x6   :  { %3828 = sst [smem:[#allocation35_spill]] %s3783_s5 }
   0x7   :  { %3829 = sst [smem:[#allocation36_spill]] %s3784_s6 }
   0x8   :  { %3830 = sst [smem:[#allocation37_spill]] %s3785_s7 }
   0x9   :  { %3831 = sst [smem:[#allocation38_spill]] %s3786_s8 }
   0xa   :  { %3832 = sst [smem:[#allocation39_spill]] %s3787_s9 }
   0xb   :  { %3833 = sst [smem:[#allocation40_spill]] %s3788_s10 }
   0xc   :  { %3834 = sst [smem:[#allocation41_spill]] %s3789_s11 }
   0xd   :  { %3835 = sst [smem:[#allocation42_spill]] %s3790_s12 }
   0xe   :  { %3836 = sst [smem:[#allocation43_spill]] %s3791_s13 }
   0xf   :  { %3837 = sst [smem:[#allocation44_spill]] %s3792_s14 }
  0x10   :  { %3838 = sst [smem:[#allocation45_spill]] %s3793_s15 }
  0x11   :  { %3839 = sst [smem:[#allocation46_spill]] %s3794_s16 }
  0x12   :  { %3840 = sst [smem:[#allocation47_spill]] %s3795_s17 }
  0x13   :  { %22 = vsyncpa [#allocation6], 0 }
  0x14   :  { %24 = vsyncpa [#allocation6 + $0x1], 0 }
  0x15   :  { %25 = vsyncpa [#allocation9], 0 }
  0x16   :  { %26 = vsyncpa [#allocation12], 0 }
  0x17   :  { %27 = vsyncpa [#allocation15], 0 }
  0x18   :  { %29 = vsyncpa [#allocation15 + $0x1], 0 }
  0x19   :  { %30 = vsyncpa [#allocation7], 0 }
  0x1a   :  { %32 = vsyncpa [#allocation7 + $0x1], 0  ;;  %s3132_s24 = smov 0   ;;  %s3134_s25 = smov 0  }
  0x1b   :  { %s3136_s26 = smov 0   ;;  %s3138_s27 = smov 0  }
  0x1c   :  { %s3140_s28 = smov 0   ;;  %s3142_s29 = smov 0  }
  0x1d   :  { %s3144_s0 = smov 0   ;;  %s3146_s30 = smov 0  }
  0x1e   :  { %s3148_s18 = smov 0   ;;  %s3150_s19 = smov 0  }
  0x1f   :  { %s3152_s1 = smov 0  }
  0x20 LB: > { %3841 = sst [smem:[#allocation23_spill]] %s2986_s25  ;;  %s3186_s20 = sadd.s32 4294967295, %s3022_s1   ;;  %s3022_s1 = sphi %s3152_s1, %s38_s1   ;;  %s3018_s19 = sphi %s3150_s19, %s3912_s19   ;;  %s3014_s18 = sphi %s3148_s18, %s3911_s18   ;;  %s3010_s30 = sphi %s3146_s30, %s3910_s30   ;;  %s3006_s0 = sphi %s3144_s0, %s3909_s0   ;;  %s3002_s29 = sphi %s3142_s29, %s3908_s29   ;;  %s2998_s28 = sphi %s3140_s28, %s3907_s28   ;;  %s2994_s27 = sphi %s3138_s27, %s3906_s27   ;;  %s2990_s26 = sphi %s3136_s26, %s3905_s26   ;;  %s2986_s25 = sphi %s3134_s25, %s3904_s25   ;;  %s2982_s24 = sphi %s3132_s24, %s3901_s24  }
  0x21   : > { %3842 = sst [smem:[#allocation24_spill]] %s3006_s0  ;;  %p306_p0 = scmp.ne.s32.totalorder %s2986_s25, %s2982_s24 }
  0x22   : > { %3843 = sst [smem:[#allocation25_spill]] %s3010_s30  ;;  %p3799_p1 = scmp.eq.s32.totalorder %s3186_s20, 0 }
  0x23   : > { %p2122_p2 = scmp.ge.s32.totalorder %s3022_s1, 1  ;;  %p458_p3 = scmp.lt.s32.totalorder %s3022_s1, 9 }
  0x24   : > { %p3194_p4 = por %p306_p0, %p3799_p1  ;;  %s3024_s23 = smov [#allocation8]  }
  0x25   : > { %p3198_p5 = pnand %p2122_p2, %p458_p3  ;;  %s470_s17 = sshll.u32 %s3024_s23, 4  ;;  %s471_s17 = int_to_ptr.vmem [resolvable:$true] %s470_s17 }
  0x26   : > { %s3844_s21 = scalar_select %p3194_p4, 1, 0 }
  0x27   : > { %s3846_s22 = scalar_select %p3198_p5, 1, 0 }
  0x28   : > { %3845 = sst [smem:[#allocation26_spill]] %s3844_s21  ;;  %p2479_p6 = pneg %p3198_p5 }
  0x29   : > { %3847 = sst [smem:[#allocation27_spill]] %s3846_s22  ;;  %s3025_s30 = smov [#allocation11]  }
  0x2a   : > { %p3206_p7 = pnand %p2479_p6, %p3799_p1  ;;  %s502_s16 = sshll.u32 %s3025_s30, 4  ;;  %s3210_s16 = int_to_ptr.vmem [resolvable:$true] %s502_s16 }
  0x2b   : > { %s3849_s10 = sld [smem:[#allocation31_spill]] }
  0x2c   : > { %s3848_s24 = scalar_select %p3206_p7, 1, 0 }
  0x2d   : > { %p3220_p9 = pneg %p3206_p7 }
  0x31   : > { %s2686_s9 = scalar_lea.hbm %s3849_s10, 1024 }
  0x32   : > { %p2687_p8 = scmp.ne.s32.totalorder %s3849_s10, %s2686_s9  ;;  %p2693_p12 = scmp.lt.u32.totalorder %s2686_s9, %s3849_s10 }
  0x34   : > { %p2689_p10 = pnand %p3220_p9, %p2687_p8 }
  0x36   : > { %p2690_p11 = pneg %p2689_p10 }
  0x38   : > { %p2695_p13 = pnand %p2693_p12, %p2690_p11 }
  0x3a   : > { %2698 = shalt.err (!%p2695_p13)
}
  0x3b   : > { %s2699_s14 = scalar_lea.vmem %s471_s17, 1024  ;;  %p2707_p6 = scmp.lt.s32.totalorder %s471_s17, %s471_s17 }
  0x3c   : > { %p2700_p0 = scmp.ne.s32.totalorder %s471_s17, %s2699_s14  ;;  %p2708_p1 = scmp.lt.s32.totalorder %s2699_s14, %s2699_s14 }
  0x3e   : > { %p2702_p2 = pnand %p2700_p0, %p3220_p9  ;;  %p2709_p4 = por %p2708_p1, %p2707_p6 }
  0x40   : > { %p2703_p3 = pneg %p2702_p2 }
  0x42   : > { %p2710_p5 = pnand %p2709_p4, %p2703_p3 }
  0x44   : > { %2713 = shalt.err (!%p2710_p5)
}
  0x45   : > { %s3805_s6 = smov 64   ;;  %s3818_s8 = smov 4  }
  0x46   : > { %2482 = dma.hbm_to_vmem [thread:$0]  (!%p3206_p7), %s3849_s10, 1024, %s471_s17, [#allocation9], %s3805_s6, %s3805_s6, %s3818_s8  }
  0x47   : > { %s3851_s5 = sld [smem:[#allocation35_spill]] }
  0x4d   : > { %s2714_s4 = scalar_lea.hbm %s3851_s5, 1024 }
  0x4e   : > { %p2715_p1 = scmp.ne.s32.totalorder %s3851_s5, %s2714_s4  ;;  %p2721_p8 = scmp.lt.u32.totalorder %s2714_s4, %s3851_s5 }
  0x50   : > { %p2717_p4 = pnand %p2715_p1, %p3220_p9 }
  0x52   : > { %p2718_p5 = pneg %p2717_p4 }
  0x54   : > { %p2723_p10 = pnand %p2721_p8, %p2718_p5 }
  0x56   : > { %2726 = shalt.err (!%p2723_p10)
}
  0x57   : > { %s2727_s17 = scalar_lea.vmem %s3210_s16, 1024  ;;  %p2735_p0 = scmp.lt.s32.totalorder %s3210_s16, %s3210_s16 }
  0x58   : > { %p2728_p11 = scmp.ne.s32.totalorder %s3210_s16, %s2727_s17  ;;  %p2736_p2 = scmp.lt.s32.totalorder %s2727_s17, %s2727_s17 }
  0x5a   : > { %p2730_p12 = pnand %p2728_p11, %p3220_p9  ;;  %p2737_p3 = por %p2736_p2, %p2735_p0 }
  0x5c   : > { %p2731_p13 = pneg %p2730_p12 }
  0x5e   : > { %p2738_p6 = pnand %p2737_p3, %p2731_p13 }
  0x60   : > { %2741 = shalt.err (!%p2738_p6)
}
  0x61   : > { %2488 = dma.hbm_to_vmem [thread:$0]  (!%p3206_p7), %s3851_s5, 1024, %s3210_s16, [#allocation12], %s3805_s6, %s3805_s6, %s3818_s8  }
  0x62   : > { %p3808_p1 = scmp.eq.s32.totalorder %s3022_s1, 0  ;;  %p300_p4 = scmp.ne.s32.totalorder %s2990_s26, %s2986_s25 }
  0x63   : > { %p3807_p5 = scmp.lt.s32.totalorder %s3022_s1, 8  ;;  %s568_s21 = sand.u32 1, %s3022_s1  }
  0x64   : > { %s570_s2 = sand.u32 1, %s2990_s26   ;;  %p302_p8 = por %p300_p4, %p3808_p1 }
  0x65   : > { %s3274_s9 = sshll.u32 %s570_s2, 6  ;;  %s2131_s15 = sshll.u32 %s3014_s18, 6 }
  0x66   : > { %s3852_s11 = sld [smem:[#allocation41_spill]]  ;;  %s572_s16 = scalar_lea.vmem [#allocation14], %s3274_s9 }
  0x67   : > { %s578_s4 = sshll.u32 %s572_s16, 4  ;;  %p3285_p10 = pnand %p3807_p5, %p302_p8  ;;  %s3289_s4 = int_to_ptr.vmem [resolvable:$true] %s578_s4 }
  0x68   : > { %s3291_s2 = scalar_lea.sflag [#allocation15], %s568_s21 }
  0x69   : > { %s3853_s12 = scalar_select %p3285_p10, 1, 0 }
  0x6a   : > { %p3815_p12 = pneg %p3285_p10 }
  0x6c   : > { %s3280_s17 = scalar_lea.hbm %s3852_s11, %s2131_s15  ;;  %s2747_s16 = scalar_lea.hbm %s3852_s11, 4096 }
  0x6d   : > { %s2742_s30 = scalar_lea.hbm %s3280_s17, 1024  ;;  %p2748_p2 = scmp.lt.u32.totalorder %s3280_s17, %s3852_s11 }
  0x6e   : > { %p2743_p11 = scmp.ne.s32.totalorder %s3280_s17, %s2742_s30  ;;  %p2749_p3 = scmp.lt.u32.totalorder %s2747_s16, %s2742_s30 }
  0x6f   : > { %p2751_p4 = scmp.lt.u32.totalorder %s2742_s30, %s3280_s17 }
  0x70   : > { %p2745_p13 = pnand %p3815_p12, %p2743_p11  ;;  %p2750_p6 = por %p2749_p3, %p2748_p2 }
  0x72   : > { %p2746_p0 = pneg %p2745_p13  ;;  %p2752_p8 = por %p2751_p4, %p2750_p6 }
  0x74   : > { %p2753_p5 = pnand %p2752_p8, %p2746_p0 }
  0x76   : > { %2756 = shalt.err (!%p2753_p5)
}
  0x77   : > { %s2757_s21 = scalar_lea.vmem %s3289_s4, 1024  ;;  %s3028_s15 = smov [#allocation14]  }
  0x78   : > { %p2758_p11 = scmp.ne.s32.totalorder %s3289_s4, %s2757_s21  ;;  %s2762_s14 = sshll.u32 %s3028_s15, 4  ;;  %s2763_s14 = int_to_ptr.vmem [resolvable:$false] %s2762_s14 }
  0x79   : > { %s2764_s6 = scalar_lea.vmem %s2763_s14, 2048  ;;  %p2765_p7 = scmp.lt.s32.totalorder %s3289_s4, %s2763_s14 }
  0x7a   : > { %p2760_p13 = pnand %p2758_p11, %p3815_p12  ;;  %p2766_p2 = scmp.lt.s32.totalorder %s2764_s6, %s2757_s21 }
  0x7c   : > { %p2761_p1 = pneg %p2760_p13  ;;  %p2767_p3 = por %p2766_p2, %p2765_p7 }
  0x7e   : > { %p2768_p6 = pnand %p2767_p3, %p2761_p1 }
  0x80   : > { %2771 = shalt.err (!%p2768_p6)
}
  0x81   : > { %s3029_s0 = smov 256   ;;  %s3854_s30 = smov 64  }
  0x82   : > { %2498 = dma.hbm_to_vmem [thread:$0]  (!%p3285_p10), %s3280_s17, 1024, %s3289_s4, %s3291_s2, %s3029_s0, %s3854_s30, %s3818_s8  }
  0x83   : > { %s3030_s16 = smov [#allocation10]   ;;  %s3031_s15 = smov [#allocation13]  }
  0x84   : > { %s486_s5 = sshll.u32 %s3030_s16, 4  ;;  %s518_s10 = sshll.u32 %s3031_s15, 4  ;;  %s487_s5 = int_to_ptr.vmem [resolvable:$true] %s486_s5  ;;  %s519_s10 = int_to_ptr.vmem [resolvable:$true] %s518_s10 }
  0x85   : > { %s3855_s3 = sld [smem:[#allocation33_spill]] }
  0x8b   : > { %s2772_s6 = scalar_lea.hbm %s3855_s3, 1024 }
  0x8c   : > { %p2773_p7 = scmp.ne.s32.totalorder %s3855_s3, %s2772_s6  ;;  %p2779_p0 = scmp.lt.u32.totalorder %s2772_s6, %s3855_s3 }
  0x8e   : > { %p2775_p1 = pnand %p2773_p7, %p3220_p9 }
  0x90   : > { %p2776_p5 = pneg %p2775_p1 }
  0x92   : > { %p2781_p4 = pnand %p2779_p0, %p2776_p5 }
  0x94   : > { %2784 = shalt.err (!%p2781_p4)
}
  0x95   : > { %s2785_s17 = scalar_lea.vmem %s487_s5, 1024  ;;  %p2793_p2 = scmp.lt.s32.totalorder %s487_s5, %s487_s5 }
  0x96   : > { %p2786_p8 = scmp.ne.s32.totalorder %s487_s5, %s2785_s17  ;;  %p2794_p3 = scmp.lt.s32.totalorder %s2785_s17, %s2785_s17 }
  0x98   : > { %p2788_p11 = pnand %p2786_p8, %p3220_p9  ;;  %p2795_p6 = por %p2794_p3, %p2793_p2 }
  0x9a   : > { %p2789_p13 = pneg %p2788_p11 }
  0x9c   : > { %p2796_p12 = pnand %p2795_p6, %p2789_p13 }
  0x9e   : > { %2799 = shalt.err (!%p2796_p12)
}
  0x9f   : > { %p3856_p7 = scmp.ne.s32.totalorder %s3848_s24, 0  ;;  %s3857_s7 = sld [smem:[#allocation37_spill]] }
  0xa1   : > { %2485 = dma.hbm_to_vmem [thread:$0]  (!%p3856_p7), %s3855_s3, 1024, %s487_s5, [#allocation9], %s3854_s30, %s3854_s30, %s3818_s8  }
  0xa5   : > { %s2800_s4 = scalar_lea.hbm %s3857_s7, 1024 }
  0xa6   : > { %p2801_p1 = scmp.ne.s32.totalorder %s3857_s7, %s2800_s4  ;;  %p2807_p0 = scmp.lt.u32.totalorder %s2800_s4, %s3857_s7 }
  0xa8   : > { %p2803_p12 = pnand %p2801_p1, %p3220_p9 }
  0xaa   : > { %p2804_p5 = pneg %p2803_p12 }
  0xac   : > { %p2809_p4 = pnand %p2807_p0, %p2804_p5 }
  0xae   : > { %2812 = shalt.err (!%p2809_p4)
}
  0xaf   : > { %s2813_s21 = scalar_lea.vmem %s519_s10, 1024  ;;  %p2821_p2 = scmp.lt.s32.totalorder %s519_s10, %s519_s10 }
  0xb0   : > { %p2814_p8 = scmp.ne.s32.totalorder %s519_s10, %s2813_s21  ;;  %p2822_p3 = scmp.lt.s32.totalorder %s2813_s21, %s2813_s21 }
  0xb2   : > { %p2816_p11 = pnand %p2814_p8, %p3220_p9  ;;  %p2823_p6 = por %p2822_p3, %p2821_p2 }
  0xb4   : > { %p2817_p13 = pneg %p2816_p11 }
  0xb6   : > { %p2824_p10 = pnand %p2823_p6, %p2817_p13 }
  0xb8   : > { %2827 = shalt.err (!%p2824_p10)
}
  0xb9   : > { %2491 = dma.hbm_to_vmem [thread:$0]  (!%p3856_p7), %s3857_s7, 1024, %s519_s10, [#allocation12], %s3854_s30, %s3854_s30, %s3818_s8  }
  0xba   : > { %s2121_s24 = sadd.s32 4294967294, %s3022_s1   ;;  %s47_s23 = sadd.s32 1, %s3014_s18 }
  0xbb   : > { %s50_s17 = sadd.s32 1, %s3018_s19  ;;  %p48_p9 = scmp.ge.s32.totalorder %s47_s23, 4 }
  0xbc   : > { %s57_s11 = sadd.s32 1, %s3002_s29  ;;  %p64_p10 = scmp.ne.s32.totalorder %s3002_s29, %s2998_s28 }
  0xbd   : > { %p70_p1 = scmp.ne.s32.totalorder %s2998_s28, %s2994_s27  ;;  %s3914_s23 = smov (%p48_p9, %s47_s23), 0 }
  0xbe   : > { %3858 = sst [smem:[#allocation28_spill]] %s3914_s23  ;;  %s3916_s17 = smov (!%p48_p9, %s50_s17), %s3018_s19 }
  0xbf   : > { %p3859_p7 = scmp.eq.s32.totalorder %s3022_s1, 0  ;;  %p3861_p5 = scmp.eq.s32.totalorder %s3186_s20, 0 }
  0xc0   : > { %p52_p4 = scmp.ge.s32.totalorder %s3916_s17, 2  ;;  %s290_s25 = ssub.s32 %s3014_s18, %s3914_s23 }
  0xc1   : > { %p3379_p12 = por %p3859_p7, %p64_p10  ;;  %p3388_p0 = por %p3861_p5, %p70_p1 }
  0xc2   : > { %p291_p8 = scmp.eq.s32.totalorder %s290_s25, 0  ;;  %p445_p11 = scmp.eq.s32.totalorder %s3186_s20, 7 }
  0xc3   : > { %s3918_s17 = smov (%p52_p4, %s3916_s17), 0  ;;  %s3864_s22 = sadd.s32 1, %s2990_s26 }
  0xc4   : > { %3863 = sst [smem:[#allocation29_spill]] %s3918_s17  ;;  %s54_s0 = ssub.s32 %s3018_s19, %s3918_s17 }
  0xc5   : > { %s3400_s4 = scalar_select %p291_p8, %s2990_s26, %s3864_s22  }
  0xc6   : > { %p3407_p13 = por %p445_p11, %p64_p10  ;;  %p55_p2 = scmp.eq.s32.totalorder %s54_s0, 0 }
  0xc7   : > { %p451_p3 = scmp.eq.s32.totalorder %s2121_s24, 7  ;;  %s550_s15 = sand.u32 1, %s3002_s29  }
  0xc8   : > { %s3865_s16 = scalar_select %p3407_p13, 1, 0 }
  0xc9   : > { %s2129_s14 = sshll.u32 %s3018_s19, 7  ;;  %p3419_p6 = por %p451_p3, %p70_p1 }
  0xca   : > { %s3414_s21 = scalar_select %p55_p2, %s3002_s29, %s57_s11  }
  0xcb   : > { %s3866_s5 = scalar_select %p3419_p6, 1, 0 }
  0xcc   : > { %s2128_s6 = sshll.u32 %s550_s15, 3  ;;  %s3867_s8 = sld [smem:[#allocation30_spill]] }
  0xcd   : > { %p3868_p9 = scmp.lt.s32.totalorder %s3022_s1, 8  ;;  %s554_s11 = scalar_lea.vmem [#allocation5], %s2128_s6 }
  0xce   : > { %s561_s0 = sshll.u32 %s554_s11, 4  ;;  %s551_s7 = scalar_lea.sflag [#allocation6], %s550_s15  ;;  %s3436_s0 = int_to_ptr.vmem [resolvable:$true] %s561_s0 }
  0xcf   : > { %p3432_p10 = pnand %p3868_p9, %p3379_p12 }
  0xd1   : > { %p2830_p7 = pneg %p3432_p10 }
  0xd2   : > { %s3426_s3 = scalar_lea.hbm %s3867_s8, %s2129_s14  ;;  %s2833_s22 = scalar_lea.hbm %s3867_s8, 256 }
  0xd3   : > { %s2828_s25 = scalar_lea.hbm %s3426_s3, 128  ;;  %p2834_p12 = scmp.lt.u32.totalorder %s3426_s3, %s3867_s8 }
  0xd4   : > { %p2829_p1 = scmp.ne.s32.totalorder %s3426_s3, %s2828_s25  ;;  %p2835_p8 = scmp.lt.u32.totalorder %s2833_s22, %s2828_s25 }
  0xd5   : > { %p2837_p2 = scmp.lt.u32.totalorder %s2828_s25, %s3426_s3 }
  0xd6   : > { %p2831_p5 = pnand %p2830_p7, %p2829_p1  ;;  %p2836_p11 = por %p2835_p8, %p2834_p12 }
  0xd8   : > { %p2832_p4 = pneg %p2831_p5  ;;  %p2838_p3 = por %p2837_p2, %p2836_p11 }
  0xda   : > { %p2839_p9 = pnand %p2838_p3, %p2832_p4 }
  0xdc   : > { %2842 = shalt.err (!%p2839_p9)
}
  0xdd   : > { %s2843_s15 = scalar_lea.vmem %s3436_s0, 128  ;;  %s3032_s6 = smov [#allocation5]  }
  0xde   : > { %p2844_p1 = scmp.ne.s32.totalorder %s3436_s0, %s2843_s15  ;;  %s2848_s11 = sshll.u32 %s3032_s6, 4  ;;  %s2849_s11 = int_to_ptr.vmem [resolvable:$false] %s2848_s11 }
  0xdf   : > { %s2850_s23 = scalar_lea.vmem %s2849_s11, 256  ;;  %p2851_p13 = scmp.lt.s32.totalorder %s3436_s0, %s2849_s11 }
  0xe0   : > { %p2846_p5 = pnand %p2844_p1, %p2830_p7  ;;  %p2852_p12 = scmp.lt.s32.totalorder %s2850_s23, %s2843_s15 }
  0xe2   : > { %p2847_p6 = pneg %p2846_p5  ;;  %p2853_p8 = por %p2852_p12, %p2851_p13 }
  0xe4   : > { %p2854_p11 = pnand %p2853_p8, %p2847_p6 }
  0xe6   : > { %2857 = shalt.err (!%p2854_p11)
}
  0xe7   : > { %2495 = dma.hbm_to_vmem [thread:$0]  (!%p3432_p10), %s3426_s3, 128, %s3436_s0, %s551_s7  }
  0xe8   : > { %s2216_s17 = sshll.u32 %s3014_s18, 10  ;;  %s598_s25 = scalar_lea.vmem [#allocation16], %s3274_s9 }
  0xe9   : > { %s605_s10 = sshll.u32 %s598_s25, 4  ;;  %s3870_s6 = sld [smem:[#allocation43_spill]]  ;;  %s3470_s10 = int_to_ptr.vmem [resolvable:$true] %s605_s10 }
  0xea   : > { %p3871_p6 = scmp.ne.s32.totalorder %s3853_s12, 0 }
  0xec   : > { %p3872_p7 = pneg %p3871_p6 }
  0xef   : > { %s3468_s8 = scalar_lea.hbm %s3870_s6, %s2216_s17  ;;  %s2863_s9 = scalar_lea.hbm %s3870_s6, 4096 }
  0xf0   : > { %s2858_s24 = scalar_lea.hbm %s3468_s8, 1024  ;;  %p2864_p2 = scmp.lt.u32.totalorder %s3468_s8, %s3870_s6 }
  0xf1   : > { %p2859_p13 = scmp.ne.s32.totalorder %s3468_s8, %s2858_s24  ;;  %p2865_p3 = scmp.lt.u32.totalorder %s2863_s9, %s2858_s24 }
  0xf2   : > { %p2867_p1 = scmp.lt.u32.totalorder %s2858_s24, %s3468_s8 }
  0xf3   : > { %p2861_p4 = pnand %p2859_p13, %p3872_p7  ;;  %p2866_p9 = por %p2865_p3, %p2864_p2 }
  0xf5   : > { %p2862_p10 = pneg %p2861_p4  ;;  %p2868_p5 = por %p2867_p1, %p2866_p9 }
  0xf7   : > { %p2869_p12 = pnand %p2868_p5, %p2862_p10 }
  0xf9   : > { %2872 = shalt.err (!%p2869_p12)
}
  0xfa   : > { %s2873_s11 = scalar_lea.vmem %s3470_s10, 1024  ;;  %p3873_p11 = pmov %p3872_p7 }
  0xfb   : > { %p2874_p8 = scmp.ne.s32.totalorder %s3470_s10, %s2873_s11  ;;  %s3033_s23 = smov [#allocation16]  }
  0xfc   : > { %s2878_s17 = sshll.u32 %s3033_s23, 4  ;;  %s2879_s17 = int_to_ptr.vmem [resolvable:$false] %s2878_s17 }
  0xfd   : > { %p2876_p13 = pnand %p2874_p8, %p3873_p11  ;;  %s2880_s25 = scalar_lea.vmem %s2879_s17, 2048 }
  0xfe   : > { %p2881_p4 = scmp.lt.s32.totalorder %s3470_s10, %s2879_s17  ;;  %p2882_p2 = scmp.lt.s32.totalorder %s2880_s25, %s2873_s11 }
  0xff   : > { %p2877_p7 = pneg %p2876_p13 }
 0x100   : > { %p2883_p3 = por %p2882_p2, %p2881_p4 }
 0x102   : > { %p2884_p9 = pnand %p2883_p3, %p2877_p7 }
 0x104   : > { %2887 = shalt.err (!%p2884_p9)
}
 0x105   : > { %s3874_s14 = smov 4   ;;  %s3875_s22 = sld [smem:[#allocation27_spill]] }
 0x106   : > { %2501 = dma.hbm_to_vmem [thread:$0]  (!%p3871_p6), %s3468_s8, 1024, %s3470_s10, %s3291_s2, %s3854_s30, %s3854_s30, %s3874_s14  }
 0x10b   : > { %p3876_p10 = scmp.ne.s32.totalorder %s3875_s22, 0 }
 0x10c   : > { %s3502_s24 = sand.u32 (!%p3876_p10), 1, %s2998_s28  }
 0x10d   : > { %617 = sbr.rel (%p3876_p10) target bundleno = 4371 (0x1113), region = 88  ;;  %s2136_s3 = sshll.u32 (!%p3876_p10), %s3502_s24, 3 }
 0x10e   : > { %s620_s7 = scalar_lea.sflag (!%p3876_p10), [#allocation6], %s3502_s24  ;;  %s3506_s9 = scalar_lea.vmem (!%p3876_p10), [#allocation5], %s2136_s3 }
 0x114   : > { %2961 = dma.done.wait (%p3388_p0), %s620_s7, 128  }
 0x115   : > { %2963 = vsyncadd (%p3388_p0), %s620_s7, 4294967168  ;;  %p3877_p6 = scmp.eq.s32.totalorder %s3186_s20, 0 }
 0x117   : > { %2965 = dma.done.wait (%p3877_p6), [#allocation9], 2048   ;;  %p3878_p1 = pmov %p3877_p6 }
 0x119   : > { %2967 = vsyncadd (%p3878_p1), [#allocation9], 4294965248  ;;  %p3879_p5 = pmov %p3878_p1 }
 0x11a   : > { %p3880_p12 = pmov %p3878_p1 }
 0x11b   : > { %2969 = dma.done.wait (%p3879_p5), [#allocation12], 2048  }
 0x11c   : > { %2971 = vsyncadd (%p3880_p12), [#allocation12], 4294965248  ;;  %s3881_s8 = sld [smem:[#allocation23_spill]]  ;;  %s3882_s12 = sld [smem:[#allocation26_spill]] }
 0x11d   : > { %s644_s2 = sand.u32 1, %s3186_s20  }
 0x11e   : > { %s645_s13 = scalar_lea.sflag [#allocation15], %s644_s2 }
 0x122   : > { %s646_s30 = sand.u32 1, %s3881_s8   ;;  %p3883_p0 = scmp.ne.s32.totalorder %s3882_s12, 0 }
 0x123   : > { %s2141_s10 = sshll.u32 %s646_s30, 6 }
 0x124   : > { %s3522_s0 = scalar_lea.vmem [#allocation14], %s2141_s10 }
 0x125   : > { %2973 = dma.done.wait (%p3883_p0), %s645_s13, 2048  }
 0x126   : > { %2975 = vsyncadd (%p3883_p0), %s645_s13, 4294965248  ;;  %s3884_s15 = sld [smem:[#allocation24_spill]]  ;;  %s3885_s25 = sld [smem:[#allocation42_spill]] }
 0x127   : > { %s3536_s14 = scalar_lea.vmem [#allocation16], %s2141_s10  ;;  %s3538_s22 = scalar_lea.vmem [#allocation17], %s2136_s3 }
 0x12c   : > { %p721_p8 = scmp.lt.s32.totalorder %s3884_s15, 3  ;;  %p2144_p11 = scmp.ne.s32.totalorder %s3884_s15, 0 }
 0x12d   : > { %v2618_v0 = vld [vmem:[#allocation10] sm:$0xff] (!%p2144_p11)   ;;  %v3034_v1 = vmov (!%p2144_p11), 0.0   ;;  %v2619_v2 = vld [vmem:[#allocation10 + $0x8] sm:$0xff] (!%p2144_p11)   ;;  %vm3035_vm0 = vmmov (!%p2144_p11), 0   ;;  %v2621_v5 = vld [vmem:[#allocation10 + $0x10] sm:$0xff] (!%p2144_p11)   ;;  %s3887_s2 = sld [smem:[#allocation32_spill]] (!%p2144_p11) }
 0x12e   : > { %s3530_s11 = scalar_select %p721_p8, %s3884_s15, 3 }
 0x12f   : > { %729 = sbr.rel (%p2144_p11) target bundleno = 3555 (0xde3), region = 120  ;;  %2307 = vmatprep.subr.bf16.mxu1 (!%p2144_p11), %v3034_v1  ;;  %1669 = vst [vmem:[#allocation4] sm:$0xff] (!%p2144_p11), %v3034_v1  ;;  %2287 = vmatprep.subr.bf16.mxu0 (!%p2144_p11), %v3034_v1  ;;  %v2620_v3 = vld [vmem:[#allocation8] sm:$0xff] (!%p2144_p11)   ;;  %v2622_v4 = vld [vmem:[#allocation8 + $0x8] sm:$0xff] (!%p2144_p11)   ;;  %v2624_v6 = vld [vmem:[#allocation8 + $0x10] sm:$0xff] (!%p2144_p11)   ;;  %vm1068_vm1 = vcmask (!%p2144_p11), 261120  }
 0x130   : > { %s723_s20 = scalar_lea.vmem %s3885_s25, %s3530_s11  ;;  %2308 = vmatpush3.bf16.msra.mxu1 (!%p2144_p11), %v2618_v0  ;;  %2323 = vmatprep.mubr.msk.bf16.mxu1 (!%p2144_p11), %vm3035_vm0, %v3034_v1  ;;  %v2623_v7 = vld [vmem:[#allocation10 + $0x18] sm:$0xff] (!%p2144_p11)   ;;  %v2625_v9 = vld [vmem:[#allocation10 + $0x20] sm:$0xff] (!%p2144_p11)   ;;  %v2627_v10 = vld [vmem:[#allocation10 + $0x28] sm:$0xff] (!%p2144_p11)   ;;  %s3036_s30 = smov (!%p2144_p11), 96   ;;  %vm1115_vm2 = vcmask (!%p2144_p11), 64512   ;;  %vm1131_vm3 = vcmask (!%p2144_p11), 1043456  }
 0x131   : > { %2309 = vmatprep.subr.bf16.mxu1 (!%p2144_p11), %v3034_v1  ;;  %2303 = vmatprep.mubr.msk.bf16.mxu0 (!%p2144_p11), %vm3035_vm0, %v3034_v1  ;;  %v2626_v8 = vld [vmem:[#allocation8 + $0x18] sm:$0xff] (!%p2144_p11)   ;;  %v2628_v11 = vld [vmem:[#allocation8 + $0x20] sm:$0xff] (!%p2144_p11)   ;;  %v2630_v12 = vld [vmem:[#allocation8 + $0x28] sm:$0xff] (!%p2144_p11)   ;;  %s3888_s15 = sld [smem:[#allocation36_spill]] (!%p2144_p11)  ;;  %s3037_s23 = smov (!%p2144_p11), 64   ;;  %vm1521_vm4 = vcmask (!%p2144_p11), 523264  }
 0x132   : > { %2288 = vmatpush3.bf16.msra.mxu0 (!%p2144_p11), %v2620_v3  ;;  %v2629_v13 = vld [vmem:[#allocation10 + $0x30] sm:$0xff] (!%p2144_p11)   ;;  %v2631_v15 = vld [vmem:[#allocation10 + $0x38] sm:$0xff] (!%p2144_p11)   ;;  %v2634_v34 = vld [vmem:[#allocation11] sm:$0xff] (!%p2144_p11)   ;;  %s3038_s17 = smov (!%p2144_p11), 32   ;;  %vm1523_vm5 = vcmask (!%p2144_p11), 785408   ;;  %s3889_s7 = sld [smem:[#allocation38_spill]] (!%p2144_p11) }
 0x133   : > { %2289 = vmatprep.subr.bf16.mxu0 (!%p2144_p11), %v3034_v1  ;;  %v2632_v14 = vld [vmem:[#allocation8 + $0x30] sm:$0xff] (!%p2144_p11)   ;;  %v2633_v17 = vld [vmem:[#allocation8 + $0x38] sm:$0xff] (!%p2144_p11)   ;;  %v2635_v35 = vld [vmem:[#allocation11 + $0x8] sm:$0xff] (!%p2144_p11)   ;;  %s3890_s12 = sld [smem:[#allocation39_spill]] (!%p2144_p11)  ;;  %s3891_s10 = sld [smem:[#allocation40_spill]] (!%p2144_p11) }
 0x134   : > { %2310 = vmatpush3.bf16.msra.mxu1 (!%p2144_p11), %v2619_v2  ;;  %v3560_v16 = vld [vmem:[%s3506_s9] sm:$0xff] (!%p2144_p11)  ;;  %s3886_s9 = sld [smem:[#allocation34_spill]] (!%p2144_p11)  ;;  %v2638_v38 = vld [vmem:[#allocation11 + $0x20] sm:$0xff] (!%p2144_p11)   ;;  %v2639_v39 = vld [vmem:[#allocation11 + $0x28] sm:$0xff] (!%p2144_p11)  }
 0x135   : > { %2311 = vmatprep.subr.bf16.mxu1 (!%p2144_p11), %v3034_v1  ;;  %v731_v18 = vpack.c.bf16 (!%p2144_p11), %v3560_v16, %v3560_v16  ;;  %v2145_v21 = vld [vmem:[%s3887_s2] ss:$0 sm:$0xff] (!%p2144_p11)  ;;  %v2636_v36 = vld [vmem:[#allocation11 + $0x10] sm:$0xff] (!%p2144_p11)  }
 0x136   : > { %2290 = vmatpush3.bf16.msra.mxu0 %v2622_v4  ;;  %v2637_v37 = vld [vmem:[#allocation11 + $0x18] sm:$0xff]   ;;  %v2640_v40 = vld [vmem:[#allocation11 + $0x30] sm:$0xff]  }
 0x137   : > { %2291 = vmatprep.subr.bf16.mxu0 %v3034_v1  ;;  %v2641_v41 = vld [vmem:[#allocation11 + $0x38] sm:$0xff]  }
 0x138   : > { %2312 = vmatpush3.bf16.msra.mxu1 %v2621_v5  ;;  %v2163_v56 = vld [vmem:[%s3888_s15] ss:$0 sm:$0xff] }
 0x139   : > { %2313 = vmatprep.subr.bf16.mxu1 %v3034_v1 }
 0x13a   : > { %2292 = vmatpush3.bf16.msra.mxu0 %v2624_v6  ;;  %v2154_v19 = vld [vmem:[%s3886_s9] ss:$0 sm:$0xff] }
 0x13b   : > { %2293 = vmatprep.subr.bf16.mxu0 %v3034_v1 }
 0x13c   : > { %2314 = vmatpush3.bf16.msra.mxu1 %v2623_v7 }
 0x13d   : > { %2315 = vmatprep.subr.bf16.mxu1 %v3034_v1 }
 0x13e   : > { %2294 = vmatpush3.bf16.msra.mxu0 %v2626_v8 }
 0x13f   : > { %2295 = vmatprep.subr.bf16.mxu0 %v3034_v1 }
 0x140   : > { %2316 = vmatpush3.bf16.msra.mxu1 %v2625_v9 }
 0x141   : > { %2317 = vmatprep.subr.bf16.mxu1 %v3034_v1 }
 0x142   : > { %2296 = vmatpush3.bf16.msra.mxu0 %v2628_v11 }
 0x143   : > { %2297 = vmatprep.subr.bf16.mxu0 %v3034_v1 }
 0x144   : > { %2318 = vmatpush3.bf16.msra.mxu1 %v2627_v10 }
 0x145   : > { %2319 = vmatprep.subr.bf16.mxu1 %v3034_v1 }
 0x146   : > { %2298 = vmatpush3.bf16.msra.mxu0 %v2630_v12 }
 0x147   : > { %2299 = vmatprep.subr.bf16.mxu0 %v3034_v1 }
 0x148   : > { %2320 = vmatpush3.bf16.msra.mxu1 %v2629_v13 }
 0x149   : > { %2321 = vmatprep.subr.bf16.mxu1 %v3034_v1 }
 0x14a   : > { %2300 = vmatpush3.bf16.msra.mxu0 %v2632_v14 }
 0x14b   : > { %2301 = vmatprep.subr.bf16.mxu0 %v3034_v1 }
 0x14c   : > { %2322 = vmatpush3.bf16.msra.mxu1 %v2631_v15 }
 0x14d   : > { %2347 = vmatprep.subr.bf16.mxu1 %v3034_v1 }
 0x14e   : > { %2302 = vmatpush3.bf16.msra.mxu0 %v2633_v17 }
 0x14f   : > { %2324 = vmatmul.mubr.bf16.vlgmr.msra.gmra.mrb[0].mxu1 %v731_v18  ;;  %2327 = vmatprep.subr.bf16.mxu0 %v3034_v1 }
 0x150   : > { %2349 = vmatprep.mubr.msk.bf16.mxu1 %vm3035_vm0, %v3034_v1 }
 0x151   : > { %2304 = vmatmul.mubr.bf16.vlgmr.msra.gmra.mrb[0].mxu0 %v731_v18 }
 0x152   : > { %2343 = vmatprep.mubr.msk.bf16.mxu0 %vm3035_vm0, %v3034_v1  ;;  %2328 = vmatpush3.bf16.msra.mxu0 %v2634_v34 }
 0x153   : > { %2329 = vmatprep.subr.bf16.mxu0 %v3034_v1 }
 0x156   : > { %2330 = vmatpush3.bf16.msra.mxu0 %v2635_v35 }
 0x157   : > { %2331 = vmatprep.subr.bf16.mxu0 %v3034_v1 }
 0x15a   : > { %2332 = vmatpush3.bf16.msra.mxu0 %v2636_v36 }
 0x15b   : > { %2333 = vmatprep.subr.bf16.mxu0 %v3034_v1 }
 0x15e   : > { %2334 = vmatpush3.bf16.msra.mxu0 %v2637_v37 }
 0x15f   : > { %2335 = vmatprep.subr.bf16.mxu0 %v3034_v1 }
 0x162   : > { %2336 = vmatpush3.bf16.msra.mxu0 %v2638_v38 }
 0x163   : > { %2337 = vmatprep.subr.bf16.mxu0 %v3034_v1 }
 0x166   : > { %2338 = vmatpush3.bf16.msra.mxu0 %v2639_v39 }
 0x167   : > { %2339 = vmatprep.subr.bf16.mxu0 %v3034_v1 }
 0x16a   : > { %2340 = vmatpush3.bf16.msra.mxu0 %v2640_v40 }
 0x16b   : > { %2341 = vmatprep.subr.bf16.mxu0 %v3034_v1 }
 0x16e   : > { %2342 = vmatpush3.bf16.msra.mxu0 %v2641_v41 }
 0x16f   : > { %2395 = vmatprep.subr.bf16.mxu0 %v3034_v1 }
 0x171   : > { %2344 = vmatmul.mubr.bf16.vlgmr.msra.gmra.mrb[4].mxu0 %v731_v18 }
 0x172   : > { %2411 = vmatprep.mubr.msk.bf16.mxu0 %vm3035_vm0, %v3034_v1 }
 0x222   : > { %v949_v20 = vpop.f32.mrb[0].mxu1 }
 0x223   : > { %v950_v22 = vadd.f32 %v2154_v19, %v949_v20  ;;  %v2325_v23 = vpop.f32.mrb[1].mxu1 }
 0x224   : > { %v952_v24 = vpop.f32.mrb[2].mxu1  ;;  %v837_v25 = vpop.f32.mrb[0].mxu0 }
 0x225   : > { %v3579_v26 = vpack.c.bf16 %v950_v22, %v950_v22  ;;  %v2326_v27 = vpop.f32.mrb[3].mxu1  ;;  %v838_v28 = vadd.f32 %v2145_v21, %v837_v25  ;;  %v2305_v29 = vpop.f32.mrb[1].mxu0 }
 0x226   : > { %v840_v30 = vpop.f32.mrb[2].mxu0 }
 0x227   : > { %1179 = vrot.lane.b32.xlu1 %v3579_v26, %s3036_s30  ;;  %v3583_v31 = vpack.c.bf16 %v838_v28, %v838_v28  ;;  %v1073_v32 = vsel %vm1068_vm1, %v3579_v26, 0  ;;  %v2306_v33 = vpop.f32.mrb[3].mxu0 }
 0x228   : > { %2348 = vmatpush3.bf16.xpose.msra.mxu1 %v1073_v32 }
 0x229   : > { %2353 = vmatprep.subr.bf16.mxu1 %v3034_v1 }
 0x22b   : > { %1176 = vrot.lane.b32.xlu1 %v3583_v31, %s3036_s30 }
 0x22f   : > { %2350 = vmatmul.mubr.msk.bf16.vlgmr.msra.gmra.mrb[4].mxu1 %vm1068_vm1, %v3583_v31 }
 0x230   : > { %2355 = vmatprep.mubr.msk.bf16.mxu1 %vm3035_vm0, %v3034_v1 }
 0x244   : > { %v1061_v47 = vpop.f32.mrb[4].mxu0 }
 0x245   : > { %v2345_v48 = vpop.f32.mrb[5].mxu0  ;;  %v1062_v57 = vadd.f32 %v2163_v56, %v1061_v47 }
 0x246   : > { %v1064_v49 = vpop.f32.mrb[6].mxu0 }
 0x247   : > { %v2346_v50 = vpop.f32.mrb[7].mxu0  ;;  %v3609_v58 = vpack.c.bf16 %v1062_v57, %v1062_v57 }
 0x249   : > { %v1133_v59 = vsel %vm1131_vm3, %v3609_v58, 0 }
 0x24a   : > { %2354 = vmatpush3.bf16.msra.mxu1 %v1133_v59 }
 0x24b   : > { %2359 = vmatprep.subr.bf16.mxu1 %v3034_v1 }
 0x299   : > { %v1180_v63 = vpop.permute.xlu1 %1179 }
 0x29a   : > { %v1185_v2 = vsel %vm1068_vm1, %v1180_v63, 0 }
 0x29d   : > { %v1177_v3 = vpop.permute.xlu1 %1176 }
 0x302   : > { %v1109_v42 = vpop.f32.mrb[4].mxu1 }
 0x303   : > { %v2351_v43 = vpop.f32.mrb[5].mxu1  ;;  %v1116_v44 = vsel %vm1115_vm2, %v1109_v42, -inf }
 0x304   : > { %1117 = vmax.xlane.f32.xlu0 %v1116_v44  ;;  %v1112_v45 = vpop.f32.mrb[6].mxu1 }
 0x305   : > { %v2352_v46 = vpop.f32.mrb[7].mxu1 }
 0x391   : > { %v1118_v51 = vpop.xlane.xlu0 %1117 }
 0x392   : > { %v1119_v52 = vsub.f32 %v1109_v42, %v1118_v51 }
 0x394   : > { %v1120_v53 = vmul.f32 1.442695, %v1119_v52 }
 0x396   : > { %2650 = vpow2.f32 %v1120_v53 }
 0x3a0   : > { %v2651_v54 = vpop.eup %2650 }
 0x3a1   : > { %v1122_v55 = vsel %vm1115_vm2, %v2651_v54, 0.0 }
 0x3a2   : > { %1123 = vadd.xlane.f32.xlu0 %v1122_v55 }
 0x42f   : > { %v1124_v60 = vpop.xlane.xlu0 %1123 }
 0x430   : > { %2652 = vrcp.f32 %v1124_v60 }
 0x43a   : > { %v2653_v61 = vpop.eup %2652 }
 0x43b   : > { %v1126_v62 = vmul.f32 %v2653_v61, %v2651_v54 }
 0x43d   : > { %v1127_v0 = vpack.c.bf16 %v1126_v62, %v1126_v62 }
 0x43f   : > { %2356 = vmatmul.mubr.msk.bf16.vlgmr.msra.gmra.mrb[8].mxu1 %vm1115_vm2, %v1127_v0 }
 0x440   : > { %2360 = vmatpush3.bf16.xpose.msra.mxu1 %v1185_v2  ;;  %2361 = vmatprep.mubr.msk.bf16.mxu1 %vm3035_vm0, %v3034_v1 }
 0x441   : > { %2365 = vmatprep.subr.bf16.mxu1 %v3034_v1 }
 0x447   : > { %2362 = vmatmul.mubr.msk.bf16.vlgmr.msra.gmra.mrb[12].mxu1 %vm1068_vm1, %v1177_v3 }
 0x448   : > { %2367 = vmatprep.mubr.msk.bf16.mxu1 %vm3035_vm0, %v3034_v1 }
 0x512   : > { %v3622_v4 = vpop.f32.mrb[8].mxu1 }
 0x513   : > { %v2357_v5 = vpop.f32.mrb[9].mxu1 }
 0x514   : > { %v1172_v6 = vpop.f32.mrb[10].mxu1 }
 0x515   : > { %v2358_v7 = vpop.f32.mrb[11].mxu1 }
 0x51a   : > { %v1221_v8 = vpop.f32.mrb[12].mxu1 }
 0x51b   : > { %v2363_v9 = vpop.f32.mrb[13].mxu1  ;;  %v1227_v10 = vsel %vm1115_vm2, %v1221_v8, -inf }
 0x51c   : > { %1228 = vmax.xlane.f32.xlu0 %v1227_v10  ;;  %v1224_v11 = vpop.f32.mrb[14].mxu1  ;;  %v2642_v9 = vld [vmem:[#allocation13] sm:$0xff]   ;;  %v2643_v10 = vld [vmem:[#allocation13 + $0x8] sm:$0xff]  }
 0x51d   : > { %v2364_v12 = vpop.f32.mrb[15].mxu1  ;;  %2396 = vmatpush3.bf16.msra.mxu0 %v2642_v9  ;;  %v2644_v11 = vld [vmem:[#allocation13 + $0x10] sm:$0xff]  }
 0x51e   : > { %2397 = vmatprep.subr.bf16.mxu0 %v3034_v1  ;;  %v2645_v12 = vld [vmem:[#allocation13 + $0x18] sm:$0xff]  }
 0x521   : > { %2398 = vmatpush3.bf16.msra.mxu0 %v2643_v10 }
 0x522   : > { %2399 = vmatprep.subr.bf16.mxu0 %v3034_v1 }
 0x525   : > { %2400 = vmatpush3.bf16.msra.mxu0 %v2644_v11 }
 0x526   : > { %2401 = vmatprep.subr.bf16.mxu0 %v3034_v1 }
 0x529   : > { %2402 = vmatpush3.bf16.msra.mxu0 %v2645_v12 }
 0x52a   : > { %2403 = vmatprep.subr.bf16.mxu0 %v3034_v1 }
 0x532   : > { %1240 = vrot.lane.b32.xlu0 %v3609_v58, %s3036_s30 }
 0x536   : > { %1290 = vrot.lane.b32.xlu0 %v3579_v26, %s3037_s23 }
 0x53a   : > { %1288 = vrot.lane.b32.xlu0 %v3583_v31, %s3037_s23 }
 0x5a9   : > { %v1229_v13 = vpop.xlane.xlu0 %1228 }
 0x5aa   : > { %v1230_v14 = vsub.f32 %v1221_v8, %v1229_v13  ;;  %v2646_v13 = vld [vmem:[#allocation13 + $0x20] sm:$0xff]  }
 0x5ab   : > { %2404 = vmatpush3.bf16.msra.mxu0 %v2646_v13 }
 0x5ac   : > { %v1231_v15 = vmul.f32 1.442695, %v1230_v14  ;;  %v2647_v14 = vld [vmem:[#allocation13 + $0x28] sm:$0xff]   ;;  %2405 = vmatprep.subr.bf16.mxu0 %v3034_v1 }
 0x5ad   : > { %v1241_v17 = vpop.permute.xlu0 %1240 }
 0x5ae   : > { %2654 = vpow2.f32 %v1231_v15  ;;  %v1246_v18 = vsel %vm1131_vm3, %v1241_v17, 0  ;;  %v2648_v15 = vld [vmem:[#allocation13 + $0x30] sm:$0xff]   ;;  %v2649_v17 = vld [vmem:[#allocation13 + $0x38] sm:$0xff]  }
 0x5af   : > { %2366 = vmatpush3.bf16.msra.mxu1 %v1246_v18  ;;  %2406 = vmatpush3.bf16.msra.mxu0 %v2647_v14 }
 0x5b0   : > { %2371 = vmatprep.subr.bf16.mxu1 %v3034_v1  ;;  %2407 = vmatprep.subr.bf16.mxu0 %v3034_v1 }
 0x5b1   : > { %v1291_v24 = vpop.permute.xlu0 %1290 }
 0x5b2   : > { %v1296_v27 = vsel %vm1068_vm1, %v1291_v24, 0 }
 0x5b3   : > { %2408 = vmatpush3.bf16.msra.mxu0 %v2648_v15 }
 0x5b4   : > { %2409 = vmatprep.subr.bf16.mxu0 %v3034_v1 }
 0x5b5   : > { %v1289_v29 = vpop.permute.xlu0 %1288 }
 0x5b7   : > { %2410 = vmatpush3.bf16.msra.mxu0 %v2649_v17 }
 0x5b8   : > { %v2655_v19 = vpop.eup %2654 }
 0x5b9   : > { %v1233_v20 = vsel %vm1115_vm2, %v2655_v19, 0.0 }
 0x5ba   : > { %1234 = vadd.xlane.f32.xlu1 %v1233_v20 }
 0x5cb   : > { %1350 = vrot.lane.b32.xlu1 %v3609_v58, %s3037_s23 }
 0x647   : > { %v1235_v21 = vpop.xlane.xlu1 %1234 }
 0x648   : > { %2656 = vrcp.f32 %v1235_v21 }
 0x64b   : > { %v1351_v28 = vpop.permute.xlu1 %1350 }
 0x64c   : > { %v1356_v30 = vsel %vm1131_vm3, %v1351_v28, 0 }
 0x652   : > { %v2657_v22 = vpop.eup %2656 }
 0x653   : > { %v1237_v23 = vmul.f32 %v2657_v22, %v2655_v19 }
 0x655   : > { %v1238_v25 = vpack.c.bf16 %v1237_v23, %v1237_v23 }
 0x657   : > { %2368 = vmatmul.mubr.msk.bf16.vlgmr.msra.gmra.mrb[16].mxu1 %vm1115_vm2, %v1238_v25 }
 0x658   : > { %2372 = vmatpush3.bf16.xpose.msra.mxu1 %v1296_v27  ;;  %2373 = vmatprep.mubr.msk.bf16.mxu1 %vm3035_vm0, %v3034_v1 }
 0x659   : > { %2377 = vmatprep.subr.bf16.mxu1 %v3034_v1 }
 0x65f   : > { %2374 = vmatmul.mubr.msk.bf16.vlgmr.msra.gmra.mrb[20].mxu1 %vm1068_vm1, %v1289_v29 }
 0x660   : > { %2378 = vmatpush3.bf16.msra.mxu1 %v1356_v30  ;;  %2379 = vmatprep.mubr.msk.bf16.mxu1 %vm3035_vm0, %v3034_v1 }
 0x661   : > { %2383 = vmatprep.subr.bf16.mxu1 %v3034_v1 }
 0x72a   : > { %v1282_v32 = vpop.f32.mrb[16].mxu1 }
 0x72b   : > { %v2369_v33 = vpop.f32.mrb[17].mxu1 }
 0x72c   : > { %v1285_v34 = vpop.f32.mrb[18].mxu1 }
 0x72d   : > { %v2370_v35 = vpop.f32.mrb[19].mxu1 }
 0x732   : > { %v1332_v36 = vpop.f32.mrb[20].mxu1 }
 0x733   : > { %v2375_v37 = vpop.f32.mrb[21].mxu1  ;;  %v1338_v38 = vsel %vm1115_vm2, %v1332_v36, -inf }
 0x734   : > { %1339 = vmax.xlane.f32.xlu0 %v1338_v38  ;;  %v1335_v39 = vpop.f32.mrb[22].mxu1 }
 0x735   : > { %v2376_v40 = vpop.f32.mrb[23].mxu1 }
 0x7c1   : > { %v1340_v41 = vpop.xlane.xlu0 %1339 }
 0x7c2   : > { %v1341_v42 = vsub.f32 %v1332_v36, %v1340_v41 }
 0x7c4   : > { %v1342_v43 = vmul.f32 1.442695, %v1341_v42 }
 0x7c6   : > { %2658 = vpow2.f32 %v1342_v43 }
 0x7d0   : > { %v2659_v44 = vpop.eup %2658 }
 0x7d1   : > { %v1344_v45 = vsel %vm1115_vm2, %v2659_v44, 0.0 }
 0x7d2   : > { %1345 = vadd.xlane.f32.xlu1 %v1344_v45 }
 0x7e3   : > { %1400 = vrot.lane.b32.xlu1 %v3579_v26, %s3038_s17 }
 0x7e7   : > { %1398 = vrot.lane.b32.xlu1 %v3583_v31, %s3038_s17 }
 0x85f   : > { %v1346_v46 = vpop.xlane.xlu1 %1345 }
 0x860   : > { %2660 = vrcp.f32 %v1346_v46 }
 0x863   : > { %v1401_v49 = vpop.permute.xlu1 %1400 }
 0x864   : > { %v1406_v51 = vsel %vm1068_vm1, %v1401_v49, 0 }
 0x867   : > { %v1399_v52 = vpop.permute.xlu1 %1398 }
 0x86a   : > { %v2661_v47 = vpop.eup %2660 }
 0x86b   : > { %v1348_v48 = vmul.f32 %v2661_v47, %v2659_v44  ;;  %v2189_v44 = vld [vmem:[%s3890_s12] ss:$0 sm:$0xff] }
 0x86d   : > { %v1349_v50 = vpack.c.bf16 %v1348_v48, %v1348_v48 }
 0x86f   : > { %2380 = vmatmul.mubr.msk.bf16.vlgmr.msra.gmra.mrb[24].mxu1 %vm1115_vm2, %v1349_v50 }
 0x870   : > { %2384 = vmatpush3.bf16.xpose.msra.mxu1 %v1406_v51  ;;  %2385 = vmatprep.mubr.msk.bf16.mxu1 %vm3035_vm0, %v3034_v1 }
 0x871   : > { %2389 = vmatprep.subr.bf16.mxu1 %v3034_v1 }
 0x877   : > { %2386 = vmatmul.mubr.msk.bf16.vlgmr.msra.gmra.mrb[28].mxu1 %vm1068_vm1, %v1399_v52 }
 0x878   : > { %2391 = vmatprep.mubr.msk.bf16.mxu1 %vm3035_vm0, %v3034_v1  ;;  %v2180_v1 = vld [vmem:[%s3889_s7] ss:$0 sm:$0xff] }
 0x942   : > { %v1392_v26 = vpop.f32.mrb[24].mxu1 }
 0x943   : > { %v2381_v31 = vpop.f32.mrb[25].mxu1 }
 0x944   : > { %v1395_v53 = vpop.f32.mrb[26].mxu1 }
 0x945   : > { %v2382_v54 = vpop.f32.mrb[27].mxu1 }
 0x94a   : > { %v1442_v55 = vpop.f32.mrb[28].mxu1 }
 0x94b   : > { %v2387_v56 = vpop.f32.mrb[29].mxu1  ;;  %v1448_v57 = vsel %vm1115_vm2, %v1442_v55, -inf }
 0x94c   : > { %1449 = vmax.xlane.f32.xlu0 %v1448_v57  ;;  %v1445_v59 = vpop.f32.mrb[30].mxu1 }
 0x94d   : > { %v2388_v60 = vpop.f32.mrb[31].mxu1 }
 0x962   : > { %1460 = vrot.lane.b32.xlu0 %v3609_v58, %s3038_s17 }
 0x966   : > { %1509 = vrot.lane.b32.xlu0 %v1282_v32, %s3038_s17 }
 0x96a   : > { %1513 = vrot.lane.b32.xlu0 %v1392_v26, %s3037_s23 }
 0x9d9   : > { %v1450_v61 = vpop.xlane.xlu0 %1449 }
 0x9da   : > { %v1451_v62 = vsub.f32 %v1442_v55, %v1450_v61 }
 0x9dc   : > { %v1452_v63 = vmul.f32 1.442695, %v1451_v62 }
 0x9dd   : > { %v1461_v0 = vpop.permute.xlu0 %1460 }
 0x9de   : > { %2662 = vpow2.f32 %v1452_v63  ;;  %v1466_v2 = vsel %vm1131_vm3, %v1461_v0, 0 }
 0x9df   : > { %2390 = vmatpush3.bf16.msra.mxu1 %v1466_v2 }
 0x9e1   : > { %v1510_v22 = vpop.permute.xlu0 %1509 }
 0x9e2   : > { %v1520_v24 = vsel %vm1068_vm1, %v3622_v4, %v1510_v22 }
 0x9e5   : > { %v1514_v23 = vpop.permute.xlu0 %1513 }
 0x9e6   : > { %v1522_v25 = vsel %vm1521_vm4, %v1520_v24, %v1514_v23 }
 0x9e8   : > { %v2663_v3 = vpop.eup %2662 }
 0x9e9   : > { %v1454_v5 = vsel %vm1115_vm2, %v2663_v3, 0.0 }
 0x9ea   : > { %1455 = vadd.xlane.f32.xlu1 %v1454_v5 }
 0xa77   : > { %v1456_v6 = vpop.xlane.xlu1 %1455 }
 0xa78   : > { %2664 = vrcp.f32 %v1456_v6 }
 0xa82   : > { %v2665_v7 = vpop.eup %2664 }
 0xa83   : > { %v1458_v8 = vmul.f32 %v2665_v7, %v2663_v3 }
 0xa85   : > { %v1459_v58 = vpack.c.bf16 %v1458_v8, %v1458_v8 }
 0xa87   : > { %2392 = vmatmul.mubr.msk.bf16.vlgmr.msra.gmra.mrb[32].mxu1 %vm1115_vm2, %v1459_v58 }
 0xb5a   : > { %v1502_v18 = vpop.f32.mrb[32].mxu1 }
 0xb5b   : > { %1517 = vrot.lane.b32.xlu0 %v1502_v18, %s3036_s30  ;;  %v2393_v19 = vpop.f32.mrb[33].mxu1 }
 0xb5c   : > { %v1505_v20 = vpop.f32.mrb[34].mxu1 }
 0xb5d   : > { %v2394_v21 = vpop.f32.mrb[35].mxu1 }
 0xbcd   : > { %v1518_v27 = vpop.permute.xlu0 %1517 }
 0xbce   : > { %v1524_v28 = vsel %vm1523_vm5, %v1522_v25, %v1518_v27 }
 0xbcf   : > { %v1525_v29 = vpack.c.bf16 %v1524_v28, %v1524_v28 }
 0xbd1   : > { %2412 = vmatmul.mubr.bf16.vlgmr.msra.gmra.mrb[8].mxu0 %v1525_v29 }
 0xca4   : > { %v1631_v30 = vpop.f32.mrb[8].mxu0 }
 0xca5   : > { %v1632_v32 = vadd.f32 %v2180_v1, %v1631_v30  ;;  %v2413_v33 = vpop.f32.mrb[9].mxu0 }
 0xca6   : > { %v1634_v34 = vpop.f32.mrb[10].mxu0 }
 0xca7   : > { %v2414_v35 = vpop.f32.mrb[11].mxu0  ;;  %v1637_v36 = vadd.f32 %v1632_v32, %v3560_v16  ;;  %v2190_v16 = vld [vmem:[%s3891_s10] ss:$0 sm:$0xff] }
 0xca9   : > { %1640 = vadd.xlane.f32.xlu1 %v1637_v36 }
 0xd36   : > { %v1641_v37 = vpop.xlane.xlu1 %1640 }
 0xd37   : > { %v1643_v38 = vmul.f32 0.0078125, %v1641_v37 }
 0xd39   : > { %v1644_v4 = vsub.f32 %v1637_v36, %v1643_v38 }
 0xd3b   : > { %v1645_v39 = vmul.f32 %v1644_v4, %v1644_v4 }
 0xd3d   : > { %1646 = vadd.xlane.f32.xlu0 %v1645_v39 }
 0xdca   : > { %v1647_v40 = vpop.xlane.xlu0 %1646 }
 0xdcb   : > { %v1648_v41 = vmul.f32 0.0078125, %v1647_v40 }
 0xdcd   : > { %v1649_v42 = vadd.f32 1e-05, %v1648_v41 }
 0xdcf   : > { %2666 = vrsqrt.f32 %v1649_v42 }
 0xdd9   : > { %v2667_v43 = vpop.eup %2666 }
 0xdda   : > { %v1651_v45 = vmul.f32 %v2667_v43, %v1644_v4 }
 0xddc   : > { %v1658_v46 = vmul.f32 %v2189_v44, %v1651_v45 }
 0xdde   : > { %v1665_v47 = vadd.f32 %v2190_v16, %v1658_v46 }
 0xde0   : > { %1666 = vst [vmem:[#allocation2] sm:$0xff] %v1665_v47  ;;  %v1667_v48 = vpack.c.bf16 %v1665_v47, %v1665_v47 }
 0xde2   : > { %1668 = vst [vmem:[#allocation3] sm:$0xf] %v1667_v48 }
 0xde3 PF: > { %v2668_v49 = vld [vmem:[%s3522_s0] sm:$0xff]   ;;  %v3039_v50 = vmov 0.0   ;;  %v2669_v51 = vld [vmem:[%s3522_s0 + $0x8] sm:$0xff]   ;;  %vm3040_vm6 = vmmov 0   ;;  %v2670_v52 = vld [vmem:[%s3522_s0 + $0x10] sm:$0xff]  }
 0xde4   : > { %2415 = vmatprep.subr.bf16.mxu0 %v3039_v50  ;;  %2435 = vmatprep.subr.bf16.mxu1 %v3039_v50  ;;  %v2676_v26 = vld [vmem:[%s3536_s14] sm:$0xff]   ;;  %v2671_v31 = vld [vmem:[%s3522_s0 + $0x18] sm:$0xff]   ;;  %v2677_v53 = vld [vmem:[%s3536_s14 + $0x8] sm:$0xff]  }
 0xde5   : > { %2416 = vmatpush3.bf16.msra.mxu0 %v2668_v49  ;;  %2431 = vmatprep.mubr.msk.bf16.mxu0 %vm3040_vm6, %v3039_v50  ;;  %v2672_v54 = vld [vmem:[%s3522_s0 + $0x20] sm:$0xff]   ;;  %v2678_v55 = vld [vmem:[%s3536_s14 + $0x10] sm:$0xff]   ;;  %v2673_v56 = vld [vmem:[%s3522_s0 + $0x28] sm:$0xff]  }
 0xde6   : > { %2417 = vmatprep.subr.bf16.mxu0 %v3039_v50  ;;  %2451 = vmatprep.mubr.msk.bf16.mxu1 %vm3040_vm6, %v3039_v50  ;;  %v2679_v57 = vld [vmem:[%s3536_s14 + $0x18] sm:$0xff]   ;;  %v2674_v59 = vld [vmem:[%s3522_s0 + $0x30] sm:$0xff]   ;;  %v2680_v60 = vld [vmem:[%s3536_s14 + $0x20] sm:$0xff]  }
 0xde7   : > { %2436 = vmatpush3.bf16.msra.mxu1 %v2676_v26  ;;  %v2675_v61 = vld [vmem:[%s3522_s0 + $0x38] sm:$0xff]   ;;  %v2681_v62 = vld [vmem:[%s3536_s14 + $0x28] sm:$0xff]   ;;  %v2682_v0 = vld [vmem:[%s3536_s14 + $0x30] sm:$0xff]   ;;  %s3893_s0 = sld [smem:[#allocation24_spill]] }
 0xde8   : > { %2437 = vmatprep.subr.bf16.mxu1 %v3039_v50  ;;  %v2683_v2 = vld [vmem:[%s3536_s14 + $0x38] sm:$0xff]   ;;  %v1783_v11 = vld [vmem:[#allocation4] sm:$0xff] }
 0xde9   : > { %2418 = vmatpush3.bf16.msra.mxu0 %v2669_v51  ;;  %v1670_v63 = vld [vmem:[#allocation3] sm:$0xf]  ;;  %v2191_v3 = vld [vmem:[%s723_s20] ss:$0 sm:$0xff] }
 0xdea   : > { %2419 = vmatprep.subr.bf16.mxu0 %v3039_v50 }
 0xdeb   : > { %2438 = vmatpush3.bf16.msra.mxu1 %v2677_v53 }
 0xdec   : > { %2439 = vmatprep.subr.bf16.mxu1 %v3039_v50 }
 0xded   : > { %2420 = vmatpush3.bf16.msra.mxu0 %v2670_v52  ;;  %p2208_p13 = scmp.ne.s32.totalorder %s3893_s0, 3 }
 0xdee   : > { %2421 = vmatprep.subr.bf16.mxu0 %v3039_v50  ;;  %s3894_s14 = sld [smem:[#allocation44_spill]] (!%p2208_p13)  ;;  %v1904_v20 = vld [vmem:[#allocation2] sm:$0xff] (!%p2208_p13)  ;;  %s3895_s3 = sld [smem:[#allocation45_spill]] (!%p2208_p13) }
 0xdef   : > { %2440 = vmatpush3.bf16.msra.mxu1 %v2678_v55  ;;  %s3896_s8 = sld [smem:[#allocation46_spill]] (!%p2208_p13) }
 0xdf0   : > { %2441 = vmatprep.subr.bf16.mxu1 %v3039_v50 }
 0xdf1   : > { %2422 = vmatpush3.bf16.msra.mxu0 %v2671_v31 }
 0xdf2   : > { %2423 = vmatprep.subr.bf16.mxu0 %v3039_v50 }
 0xdf3   : > { %2442 = vmatpush3.bf16.msra.mxu1 %v2679_v57 }
 0xdf4   : > { %2443 = vmatprep.subr.bf16.mxu1 %v3039_v50  ;;  %v2209_v19 = vld [vmem:[%s3894_s14] ss:$0 sm:$0xff] (!%p2208_p13) }
 0xdf5   : > { %2424 = vmatpush3.bf16.msra.mxu0 %v2672_v54  ;;  %v2210_v32 = vld [vmem:[%s3895_s3] ss:$0 sm:$0xff] (!%p2208_p13) }
 0xdf6   : > { %2425 = vmatprep.subr.bf16.mxu0 %v3039_v50  ;;  %v2211_v34 = vld [vmem:[%s3896_s8] ss:$0 sm:$0xff] (!%p2208_p13) }
 0xdf7   : > { %2444 = vmatpush3.bf16.msra.mxu1 %v2680_v60 }
 0xdf8   : > { %2445 = vmatprep.subr.bf16.mxu1 %v3039_v50 }
 0xdf9   : > { %2426 = vmatpush3.bf16.msra.mxu0 %v2673_v56 }
 0xdfa   : > { %2427 = vmatprep.subr.bf16.mxu0 %v3039_v50 }
 0xdfb   : > { %2446 = vmatpush3.bf16.msra.mxu1 %v2681_v62 }
 0xdfc   : > { %2447 = vmatprep.subr.bf16.mxu1 %v3039_v50 }
 0xdfd   : > { %2428 = vmatpush3.bf16.msra.mxu0 %v2674_v59 }
 0xdfe   : > { %2429 = vmatprep.subr.bf16.mxu0 %v3039_v50 }
 0xdff   : > { %2448 = vmatpush3.bf16.msra.mxu1 %v2682_v0 }
 0xe00   : > { %2449 = vmatprep.subr.bf16.mxu1 %v3039_v50 }
 0xe01   : > { %2430 = vmatpush3.bf16.msra.mxu0 %v2675_v61 }
 0xe03   : > { %2450 = vmatpush3.bf16.msra.mxu1 %v2683_v2 }
 0xe04   : > { %2432 = vmatmul.mubr.bf16.vlgmr.msra.gmra.mrb[0].mxu0 %v1670_v63 }
 0xed7   : > { %v1776_v5 = vpop.f32.mrb[0].mxu0 }
 0xed8   : > { %v1777_v6 = vadd.f32 %v2191_v3, %v1776_v5  ;;  %v2433_v7 = vpop.f32.mrb[1].mxu0 }
 0xed9   : > { %v1779_v8 = vpop.f32.mrb[2].mxu0 }
 0xeda   : > { %v1782_v58 = vmax.f32 %v1777_v6, 0.0  ;;  %v2434_v9 = vpop.f32.mrb[3].mxu0 }
 0xedc   : > { %v1784_v10 = vpack.c.bf16 %v1782_v58, %v1782_v58 }
 0xede   : > { %2452 = vmatmul.mubr.bf16.vlgmr.msra.gmra.mrb[0].mxu1 %v1784_v10 }
 0xfae   : > { %1894 = sbr.rel (%p2208_p13) target bundleno = 4344 (0x10f8), region = 124 }
 0xfb1   : > { %v1883_v12 = vpop.f32.mrb[0].mxu1 }
 0xfb2   : > { %v1889_v13 = vadd.f32 %v1883_v12, %v1783_v11  ;;  %v2453_v14 = vpop.f32.mrb[1].mxu1 }
 0xfb3   : > { %v1886_v15 = vpop.f32.mrb[2].mxu1 }
 0xfb4   : > { %1890 = vst [vmem:[#allocation4] sm:$0xff] %v1889_v13  ;;  %v2454_v17 = vpop.f32.mrb[3].mxu1 }
 0xfbb   : > { %v1895_v18 = vld [vmem:[#allocation4] sm:$0xff] }
 0xfbc   : > { %v1903_v21 = vadd.f32 %v2209_v19, %v1895_v18 }
 0xfbe   : > { %v1905_v22 = vadd.f32 %v1904_v20, %v1903_v21 }
 0xfc0   : > { %1908 = vadd.xlane.f32.xlu0 %v1905_v22 }
0x104d   : > { %v1909_v23 = vpop.xlane.xlu0 %1908 }
0x104e   : > { %v1911_v24 = vmul.f32 0.0078125, %v1909_v23 }
0x1050   : > { %v1912_v25 = vsub.f32 %v1905_v22, %v1911_v24 }
0x1052   : > { %v1913_v27 = vmul.f32 %v1912_v25, %v1912_v25 }
0x1054   : > { %1914 = vadd.xlane.f32.xlu0 %v1913_v27 }
0x10e1   : > { %v1915_v28 = vpop.xlane.xlu0 %1914 }
0x10e2   : > { %v1916_v29 = vmul.f32 0.0078125, %v1915_v28 }
0x10e4   : > { %v1917_v1 = vadd.f32 1e-05, %v1916_v29 }
0x10e6   : > { %2684 = vrsqrt.f32 %v1917_v1 }
0x10f0   : > { %v2685_v30 = vpop.eup %2684 }
0x10f1   : > { %v1919_v33 = vmul.f32 %v2685_v30, %v1912_v25 }
0x10f3   : > { %v1926_v35 = vmul.f32 %v2210_v32, %v1919_v33 }
0x10f5   : > { %v1933_v36 = vadd.f32 %v2211_v34, %v1926_v35 }
0x10f7   : > { %1934 = vst [vmem:[%s3538_s22] sm:$0xff] %v1933_v36 }
0x10f8 PF: > { %s3897_s12 = sld [smem:[#allocation25_spill]]  ;;  %s3898_s13 = sld [smem:[#allocation47_spill]] }
0x10f9   : > { %s1949_s23 = sshll.u32 %s3538_s22, 4  ;;  %s1936_s0 = scalar_lea.sflag [#allocation7], %s3502_s24  ;;  %s1950_s23 = int_to_ptr.vmem [resolvable:$true] %s1949_s23 }
0x10fa   : > { %s2888_s11 = scalar_lea.vmem %s1950_s23, 128  ;;  %p3899_p4 = scmp.ne.s32.totalorder %s3865_s16, 0 }
0x10fb   : > { %p2889_p7 = scmp.ne.s32.totalorder %s1950_s23, %s2888_s11  ;;  %s3041_s20 = smov [#allocation17]  }
0x10fc   : > { %s2892_s14 = sshll.u32 %s3041_s20, 4  ;;  %s2893_s14 = int_to_ptr.vmem [resolvable:$false] %s2892_s14 }
0x10fd   : > { %p2890_p2 = pnand %p2889_p7, %p3899_p4  ;;  %s2894_s17 = scalar_lea.vmem %s2893_s14, 256 }
0x10fe   : > { %s2213_s2 = sshll.u32 %s3897_s12, 7  ;;  %p2895_p9 = scmp.lt.s32.totalorder %s1950_s23, %s2893_s14 }
0x10ff   : > { %s3720_s15 = scalar_lea.hbm %s3898_s13, %s2213_s2  ;;  %p2891_p3 = pneg %p2890_p2 }
0x1100   : > { %p2896_p10 = scmp.lt.s32.totalorder %s2894_s17, %s2888_s11 }
0x1102   : > { %p2897_p6 = por %p2896_p10, %p2895_p9 }
0x1104   : > { %p2898_p1 = pnand %p2897_p6, %p2891_p3 }
0x1106   : > { %2901 = shalt.err (!%p2898_p1)
}
0x1107   : > { %s2902_s24 = scalar_lea.hbm %s3720_s15, 128  ;;  %s2906_s3 = scalar_lea.hbm %s3898_s13, 256 }
0x1108   : > { %p2903_p5 = scmp.ne.s32.totalorder %s3720_s15, %s2902_s24  ;;  %p2907_p8 = scmp.lt.u32.totalorder %s3720_s15, %s3898_s13 }
0x1109   : > { %p2908_p11 = scmp.lt.u32.totalorder %s2906_s3, %s2902_s24  ;;  %p2910_p7 = scmp.lt.u32.totalorder %s2902_s24, %s3720_s15 }
0x110a   : > { %p2904_p12 = pnand %p2903_p5, %p3899_p4 }
0x110b   : > { %p2909_p13 = por %p2908_p11, %p2907_p8 }
0x110c   : > { %p2905_p0 = pneg %p2904_p12 }
0x110d   : > { %p2911_p2 = por %p2910_p7, %p2909_p13 }
0x110f   : > { %p2912_p3 = pnand %p2911_p2, %p2905_p0 }
0x1111   : > { %2915 = shalt.err (!%p2912_p3)
}
0x1112   : > { %2477 = dma.vmem_to_hbm [thread:$0]  (%p3899_p4), %s1950_s23, 128, %s3720_s15, %s1936_s0  }
0x1113 PF: > { %p2515_p9 = scmp.ge.s32.totalorder %s3022_s1, 2  ;;  %s1961_s8 = sand.u32 1, %s2994_s27  }
0x1114   : > { %p3900_p10 = scmp.ne.s32.totalorder %s3866_s5, 0  ;;  %s1962_s12 = scalar_lea.sflag [#allocation7], %s1961_s8 }
0x1116   : > { %p2503_p6 = pnand %p2515_p9, %p3900_p10 }
0x1118   : > { %2977 = dma.done.wait (!%p2503_p6), %s1962_s12, 128  }
0x1119   : > { %2979 = vsyncadd (!%p2503_p6), %s1962_s12, 4294967168  ;;  %s38_s1 = sadd.s32 1, %s3022_s1   ;;  %s3901_s24 = sld [smem:[#allocation23_spill]] }
0x111a   : > { %p35_p1 = scmp.ge.s32.totalorder %s38_s1, 10   ;;  %s3902_s16 = sld [smem:[#allocation28_spill]] }
0x111b   : > { %s3903_s2 = sld [smem:[#allocation29_spill]]  ;;  %s3904_s25 = smov %s2990_s26 }
0x111c   : > { %s3905_s26 = smov %s3400_s4  ;;  %s3906_s27 = smov %s2998_s28 }
0x111d   : > { %s3907_s28 = smov %s3002_s29  ;;  %s3908_s29 = smov %s3414_s21 }
0x111e   : > { %s3909_s0 = smov %s3014_s18  ;;  %s3910_s30 = smov %s3018_s19 }
0x111f   :  { %37 = sbr.rel (!%p35_p1) target bundleno = 32 (0x20), region = 184 }
0x1120   : > { %s3911_s18 = smov %s3902_s16 }
0x1121   : > { %s3912_s19 = smov %s3903_s2 }
0x1126   :  { %1967 = vsyncpa [#allocation6], 1 }
0x1127   :  { %1969 = vsyncpa [#allocation6 + $0x1], 1 }
0x1128   :  { %1970 = vsyncpa [#allocation9], 1 }
0x1129   :  { %1971 = vsyncpa [#allocation12], 1 }
0x112a   :  { %1972 = vsyncpa [#allocation15], 1 }
0x112b   :  { %1974 = vsyncpa [#allocation15 + $0x1], 1 }
0x112c   :  { %1975 = vsyncpa [#allocation7], 1 }
0x112d   :  { %1977 = vsyncpa [#allocation7 + $0x1], 1 }

</bundles_post_ra>
